<compile_context>
chip_gen: v7x
topology: tpu7x:2x2x1
jax: 0.10.0
libtpu: 0.0.40
codegen_flags: <defaults>
</compile_context>

<pallas_src>
import math

import jax
import jax.numpy as jnp
import numpy as np
from jax.experimental import pallas as pl
from jax.experimental.pallas import tpu as pltpu

# ---------------- model hyper-parameters (small, forward-consistent) --------
B = 2               # batch
T = 8               # max_sequence_length == seq_len
BT = B * T          # batch folded into the token (sublane) axis
D = 32              # d_model
H = 4               # num_heads
NUM_LAYERS = 2
NUM_CLASSES = 5
VOCAB = 50
EPS = 1e-6
HD = D // H         # head dim
HALF = D // 2       # RoPE half dim
FF = 4 * D          # FFN hidden
D2 = D // 2         # classifier hidden
PADC = 128          # lane-padded logits width (sliced to NUM_CLASSES outside)

# ---------------- packed layer-weight slab row offsets ([LW_ROWS, 128]) ------
R_WQKV = 0                    # rows [0, D)        lanes [0, 3D)   K-major qkv
R_WO = D                      # rows [D, 2D)       lanes [0, D)    K-major out
R_W1 = 2 * D                  # rows [2D, 3D)      lanes [0, FF)   K-major ffn1
R_W2 = 3 * D                  # rows [3D, 3D+FF)   lanes [0, D)    K-major ffn2
R_BQKV = 3 * D + FF           # single rows: biases + RMSNorm weights
R_BO = R_BQKV + 1
R_B1 = R_BQKV + 2
R_B2 = R_BQKV + 3
R_N1 = R_BQKV + 4
R_N2 = R_BQKV + 5
LW_ROWS = ((R_N2 + 1 + 7) // 8) * 8        # 232

# ---------------- packed head/classifier slab row offsets ([HS_ROWS, 128]) ---
HS_C1W = 0                    # rows [0, D)        lanes [0, D2)   K-major
HS_C2W = D                    # rows [D, D+D2)     lanes [0, PADC) K-major (pad)
HS_PNW = D + D2
HS_APW = HS_PNW + 1
HS_APB = HS_PNW + 2
HS_C1B = HS_PNW + 3
HS_C2B = HS_PNW + 4
HS_ROWS = ((HS_C2B + 1 + 7) // 8) * 8      # 56


# ---------------- in-kernel helpers ------------------------------------------
def _rmsnorm(x, w):
    # x: [N, D], w: [1, D]
    ms = jnp.mean(x * x, axis=-1, keepdims=True)
    return x * jax.lax.rsqrt(ms + EPS) * w


def _matmul(a, b):
    # a: [M, K], b: [K, N] (K-major weights) -> canonical MXU contraction.
    return jax.lax.dot_general(a, b, (((1,), (0,)), ((), ())),
                               preferred_element_type=jnp.float32)


def _erf(x):
    # Abramowitz & Stegun 7.1.26 polynomial (|err| < 1.5e-7); avoids relying on
    # an erf lowering inside Mosaic.  Used for the exact (non-tanh) GELU.
    a1, a2, a3, a4, a5 = (0.254829592, -0.284496736, 1.421413741,
                          -1.453152027, 1.061405429)
    ax = jnp.abs(x)
    t = 1.0 / (1.0 + 0.3275911 * ax)
    poly = ((((a5 * t + a4) * t + a3) * t + a2) * t + a1) * t
    y = 1.0 - poly * jnp.exp(-ax * ax)
    return jnp.where(x >= 0.0, y, -y)


# ---------------- fused forward kernel (whole batch, single grid step) -------
def fused_encoder_kernel(x_ref, bias_ref, rope_ref, lw_ref, hs_ref, o_ref):
    # ---- RoPE (embedding columns pre-permuted to [even | odd] halves) -------
    x = x_ref[...]                                   # [BT, D]
    sin = rope_ref[:, :HALF]                         # [BT, HALF] (pre-tiled)
    cos = rope_ref[:, HALF:]
    xe = x[:, :HALF]
    xo = x[:, HALF:]
    x = jnp.concatenate([xe * cos - xo * sin, xo * cos + xe * sin], axis=-1)

    # block-diagonal additive attention bias (0 / -1e9), loaded once, reused by
    # every head and every layer.
    bias = bias_ref[...]                             # [BT, BT]

    for l in range(NUM_LAYERS):                      # static unroll
        # ---------------- attention block (pre-norm) --------------------------
        res = x
        h = _rmsnorm(x, lw_ref[l, R_N1:R_N1 + 1, 0:D])
        wqkv = lw_ref[l, R_WQKV:R_WQKV + D, 0:3 * D]         # [D, 3D] K-major
        bqkv = lw_ref[l, R_BQKV:R_BQKV + 1, 0:3 * D]         # [1, 3D]
        qkv = _matmul(h, wqkv) + bqkv                        # one fused MXU op
        ctx_heads = []
        for hh in range(H):
            qh = qkv[:, hh * HD:(hh + 1) * HD]               # [BT, HD] (q pre-scaled)
            kh = qkv[:, D + hh * HD:D + (hh + 1) * HD]
            vh = qkv[:, 2 * D + hh * HD:2 * D + (hh + 1) * HD]
            s = jax.lax.dot_general(qh, kh, (((1,), (1,)), ((), ())),
                                    preferred_element_type=jnp.float32) + bias
            m = jnp.max(s, axis=-1, keepdims=True)
            p = jnp.exp(s - m)
            a = p * pl.reciprocal(jnp.sum(p, axis=-1, keepdims=True),
                                  approx=True)
            ctx_heads.append(_matmul(a, vh))                 # [BT, HD]
        ctx = jnp.concatenate(ctx_heads, axis=-1)            # [BT, D]
        wo = lw_ref[l, R_WO:R_WO + D, 0:D]                   # [D, D] K-major
        bo = lw_ref[l, R_BO:R_BO + 1, 0:D]
        x = res + _matmul(ctx, wo) + bo                      # one fused out-proj

        # ---------------- FFN block (pre-norm) --------------------------------
        res = x
        h = _rmsnorm(x, lw_ref[l, R_N2:R_N2 + 1, 0:D])
        w1 = lw_ref[l, R_W1:R_W1 + D, 0:FF]
        b1 = lw_ref[l, R_B1:R_B1 + 1, 0:FF]
        w2 = lw_ref[l, R_W2:R_W2 + FF, 0:D]
        b2 = lw_ref[l, R_B2:R_B2 + 1, 0:D]
        h1 = jnp.maximum(_matmul(h, w1) + b1, 0.0)           # custom ReLU
        x = res + _matmul(h1, w2) + b2

    # ---- pre-pooling norm + weighted pooling (per batch element) -------------
    xn = _rmsnorm(x, hs_ref[HS_PNW:HS_PNW + 1, 0:D])         # [BT, D]
    apw = hs_ref[HS_APW:HS_APW + 1, 0:D]                     # [1, D]
    apb = hs_ref[HS_APB:HS_APB + 1, 0:1]                     # [1, 1]
    pooled_rows = []
    for b in range(B):                                       # static, B == 2
        xb = xn[b * T:(b + 1) * T, :]                        # [T, D]
        sc = jnp.sum(xb * apw, axis=-1, keepdims=True) + apb  # [T, 1]
        m = jnp.max(sc, axis=0, keepdims=True)
        p = jnp.exp(sc - m)
        w = p * pl.reciprocal(jnp.sum(p, axis=0, keepdims=True), approx=True)
        pooled_rows.append(jnp.sum(xb * w, axis=0, keepdims=True))   # [1, D]
    pooled = jnp.concatenate(pooled_rows, axis=0)            # [B, D]

    # ---- classifier: Linear -> exact GELU -> Linear ---------------------------
    c1w = hs_ref[HS_C1W:HS_C1W + D, 0:D2]                    # [D, D2] K-major
    c1b = hs_ref[HS_C1B:HS_C1B + 1, 0:D2]
    c2w = hs_ref[HS_C2W:HS_C2W + D2, 0:PADC]                 # [D2, 128] K-major
    c2b = hs_ref[HS_C2B:HS_C2B + 1, 0:PADC]
    hcls = _matmul(pooled, c1w) + c1b                        # [B, D2]
    hcls = 0.5 * hcls * (1.0 + _erf(hcls * (1.0 / math.sqrt(2.0))))
    o_ref[...] = _matmul(hcls, c2w) + c2b                    # [B, 128] lane-dense


# ---------------- wrapper -----------------------------------------------------
def _full_spec(shape):
    nd = len(shape)
    return pl.BlockSpec(shape, lambda i, _nd=nd: (0,) * _nd)


@jax.jit
def encoder_pallas(token_ids, mask, kp):
    # embedding gather (plain XLA); columns already permuted to [even|odd].
    x_emb = jnp.take(kp['emb_perm'], token_ids.reshape(BT), axis=0)   # [BT, D]

    # block-diagonal additive attention bias (layout plumbing, tiny):
    # keep[b, t, b', s] = (b == b') and mask[b, t, s] != 0
    same = jnp.eye(B, dtype=bool)[:, None, :, None]                   # [B,1,B,1]
    keep = jnp.logical_and(same, mask[:, :, None, :] != 0.0)          # [B,T,B,T]
    bias = jnp.where(keep, 0.0, -1e9).astype(jnp.float32).reshape(BT, BT)

    args = (x_emb, bias, kp['rope'], kp['lw'], kp['hs'])
    out = pl.pallas_call(
        fused_encoder_kernel,
        out_shape=jax.ShapeDtypeStruct((B, PADC), jnp.float32),
        grid=(1,),
        in_specs=[_full_spec(a.shape) for a in args],
        out_specs=pl.BlockSpec((B, PADC), lambda i: (0, 0)),
        compiler_params=pltpu.CompilerParams(
            dimension_semantics=("arbitrary",)),
    )(*args)
    return out[:, :NUM_CLASSES]


# ---------------- parameter construction & kernel re-layout -------------------
def make_params(key):
    def xavier(k, out_f, in_f):
        a = math.sqrt(6.0 / (in_f + out_f))
        return jax.random.uniform(k, (out_f, in_f), jnp.float32, -a, a)

    def small(k, *shape):
        # PyTorch _init_weights zeroes biases; small random values are used
        # here instead so the numerical check exercises the bias wiring.
        return 0.01 * jax.random.normal(k, shape, jnp.float32)

    keys = iter(jax.random.split(key, 8 * NUM_LAYERS + 16))
    p = {}
    p['emb'] = 0.02 * jax.random.normal(next(keys), (VOCAB, D), jnp.float32)

    # RoPE tables (PosEncoding.init_rope_matrix with head_dim = d_model)
    theta = 10000.0 ** (-jnp.arange(HALF, dtype=jnp.float32) / HALF)
    pos = jnp.arange(T, dtype=jnp.float32)[:, None]
    angles = pos * theta[None, :]
    p['sin'] = jnp.sin(angles)
    p['cos'] = jnp.cos(angles)

    layers = []
    for _ in range(NUM_LAYERS):
        layers.append({
            'n1w': jnp.ones((D,), jnp.float32),
            'qkv_w': xavier(next(keys), 3 * D, D),
            'qkv_b': small(next(keys), 3 * D),
            'ow': xavier(next(keys), D, D),
            'ob': small(next(keys), D),
            'n2w': jnp.ones((D,), jnp.float32),
            'w1': xavier(next(keys), FF, D),
            'b1': small(next(keys), FF),
            'w2': xavier(next(keys), D, FF),
            'b2': small(next(keys), D),
        })
    p['layers'] = layers

    p['pnw'] = jnp.ones((D,), jnp.float32)
    p['apw'] = xavier(next(keys), 1, D)          # attention_pool Linear(D, 1)
    p['apb'] = small(next(keys), 1)
    p['c1w'] = xavier(next(keys), D2, D)
    p['c1b'] = small(next(keys), D2)
    p['c2w'] = xavier(next(keys), NUM_CLASSES, D2)
    p['c2b'] = small(next(keys), NUM_CLASSES)
    return p


def prep_kernel_params(p):
    """Re-lay-out parameters for the fused kernel (done once, outside jit)."""
    kp = {}
    emb = p['emb']
    # RoPE layout fix: even/odd feature columns become contiguous halves so the
    # kernel only needs two contiguous slices (no stride-2 lane gathers).
    kp['emb_perm'] = jnp.concatenate([emb[:, 0::2], emb[:, 1::2]], axis=1)
    # sin/cos pre-tiled over the batch and packed side-by-side: [BT, D].
    kp['rope'] = jnp.concatenate([jnp.tile(p['sin'], (B, 1)),
                                  jnp.tile(p['cos'], (B, 1))], axis=1)

    scale = 1.0 / math.sqrt(HD)

    def layer_slab(lp):
        s = jnp.zeros((LW_ROWS, 128), jnp.float32)
        wqkv = lp['qkv_w'].T                       # [D, 3D] K-major
        bqkv = lp['qkv_b']
        # fold the attention 1/sqrt(head_dim) scale into the Q projection
        wqkv = wqkv.at[:, :D].multiply(scale)
        bqkv = bqkv.at[:D].multiply(scale)
        s = s.at[R_WQKV:R_WQKV + D, 0:3 * D].set(wqkv)
        s = s.at[R_WO:R_WO + D, 0:D].set(lp['ow'].T)
        s = s.at[R_W1:R_W1 + D, 0:FF].set(lp['w1'].T)
        s = s.at[R_W2:R_W2 + FF, 0:D].set(lp['w2'].T)
        s = s.at[R_BQKV, 0:3 * D].set(bqkv)
        s = s.at[R_BO, 0:D].set(lp['ob'])
        s = s.at[R_B1, 0:FF].set(lp['b1'])
        s = s.at[R_B2, 0:D].set(lp['b2'])
        s = s.at[R_N1, 0:D].set(lp['n1w'])
        s = s.at[R_N2, 0:D].set(lp['n2w'])
        return s

    kp['lw'] = jnp.stack([layer_slab(lp) for lp in p['layers']])

    hs = jnp.zeros((HS_ROWS, 128), jnp.float32)
    hs = hs.at[HS_C1W:HS_C1W + D, 0:D2].set(p['c1w'].T)
    # classifier output zero-padded to 128 lanes (lane-dense final store)
    hs = hs.at[HS_C2W:HS_C2W + D2, 0:NUM_CLASSES].set(p['c2w'].T)
    hs = hs.at[HS_PNW, 0:D].set(p['pnw'])
    hs = hs.at[HS_APW, 0:D].set(p['apw'][0])
    hs = hs.at[HS_APB, 0:1].set(p['apb'])
    hs = hs.at[HS_C1B, 0:D2].set(p['c1b'])
    hs = hs.at[HS_C2B, 0:NUM_CLASSES].set(p['c2b'])
    kp['hs'] = hs
    return kp


# ---------------- pure-JAX reference (mirrors PyTorch forward, eval mode) ----
def _rmsnorm_ref(x, w):
    return x * jax.lax.rsqrt(jnp.mean(x * x, axis=-1, keepdims=True) + EPS) * w


def encoder_ref(token_ids, mask, p):
    x = p['emb'][token_ids]
    xe, xo = x[..., 0::2], x[..., 1::2]
    sin, cos = p['sin'][None], p['cos'][None]
    x = jnp.concatenate([xe * cos - xo * sin, xo * cos + xe * sin], axis=-1)
    scale = 1.0 / math.sqrt(HD)
    for lp in p['layers']:
        res = x
        h = _rmsnorm_ref(x, lp['n1w'])
        qkv = h @ lp['qkv_w'].T + lp['qkv_b']
        q = qkv[..., :D].reshape(B, T, H, HD).transpose(0, 2, 1, 3)
        k = qkv[..., D:2 * D].reshape(B, T, H, HD).transpose(0, 2, 1, 3)
        v = qkv[..., 2 * D:].reshape(B, T, H, HD).transpose(0, 2, 1, 3)
        s = (q @ jnp.swapaxes(k, -1, -2)) * scale
        s = jnp.where(mask[:, None] == 0, -1e9, s)
        a = jax.nn.softmax(s, axis=-1)
        ctx = (a @ v).transpose(0, 2, 1, 3).reshape(B, T, D)
        x = res + ctx @ lp['ow'].T + lp['ob']
        res = x
        h = _rmsnorm_ref(x, lp['n2w'])
        h = jnp.maximum(h @ lp['w1'].T + lp['b1'], 0.0)
        x = res + h @ lp['w2'].T + lp['b2']
    x = _rmsnorm_ref(x, p['pnw'])
    sc = x @ p['apw'].T + p['apb']                 # [B, T, 1]
    w = jax.nn.softmax(sc, axis=1)
    pooled = jnp.sum(x * w, axis=1)
    h = pooled @ p['c1w'].T + p['c1b']
    h = 0.5 * h * (1.0 + jax.lax.erf(h / math.sqrt(2.0)))   # exact GELU
    return h @ p['c2w'].T + p['c2b']


# ---------------- main --------------------------------------------------------
if __name__ == "__main__":
    root = jax.random.PRNGKey(0)
    k_param, k_tok = jax.random.split(root)

    params = make_params(k_param)
    kparams = prep_kernel_params(params)
    token_ids = jax.random.randint(k_tok, (B, T), 0, VOCAB)

    # self-attention mask [B, T, T]; 0 => masked (padding of last 2 tokens of
    # sample 1) to exercise the masked_fill path.
    mask = jnp.ones((B, T, T), jnp.float32)
    mask = mask.at[1, :, 6:].set(0.0)

    logits = encoder_pallas(token_ids, mask, kparams)
    logits = jax.block_until_ready(logits)

    ref = encoder_ref(token_ids, mask, params)
    assert logits.shape == (B, NUM_CLASSES)
    # Tolerance slightly relaxed to absorb the approximate EUP reciprocal used
    # in the softmax denominators (pl.reciprocal(..., approx=True)).
    assert np.allclose(np.asarray(logits), np.asarray(ref), atol=2e-3, rtol=2e-3), (
        "Pallas output mismatch vs reference")
    print("KERNEL_OK")
</pallas_src>

<mosaic_0001>
module attributes {stable_mosaic.version = 11 : i64} {
  func.func @fused_encoder_kernel(%arg0: i32, %arg1: memref<16x32xf32, #tpu.memory_space<vmem>>, %arg2: memref<16x16xf32, #tpu.memory_space<vmem>>, %arg3: memref<16x32xf32, #tpu.memory_space<vmem>>, %arg4: memref<2x232x128xf32, #tpu.memory_space<vmem>>, %arg5: memref<56x128xf32, #tpu.memory_space<vmem>>, %arg6: memref<2x128xf32, #tpu.memory_space<vmem>>) attributes {dimension_semantics = [#tpu.dimension_semantics<arbitrary>], iteration_bounds = array<i64: 1>, scalar_prefetch = 0 : i64, scratch_operands = 0 : i64, tpu.core_type = #tpu.core_type<tc>, window_params = [{pipeline_mode = #tpu.pipeline_mode<synchronous>, transform_indices = @transform_0, window_bounds = array<i64: 16, 32>}, {pipeline_mode = #tpu.pipeline_mode<synchronous>, transform_indices = @transform_1, window_bounds = array<i64: 16, 16>}, {pipeline_mode = #tpu.pipeline_mode<synchronous>, transform_indices = @transform_2, window_bounds = array<i64: 16, 32>}, {pipeline_mode = #tpu.pipeline_mode<synchronous>, transform_indices = @transform_3, window_bounds = array<i64: 2, 232, 128>}, {pipeline_mode = #tpu.pipeline_mode<synchronous>, transform_indices = @transform_4, window_bounds = array<i64: 56, 128>}, {pipeline_mode = #tpu.pipeline_mode<synchronous>, transform_indices = @transform_5, window_bounds = array<i64: 2, 128>}]} {
    %c0 = arith.constant 0 : index
    %c0_0 = arith.constant 0 : index
    %0 = vector.load %arg1[%c0, %c0_0] : memref<16x32xf32, #tpu.memory_space<vmem>>, vector<16x32xf32>
    %c0_1 = arith.constant 0 : index
    %c0_2 = arith.constant 0 : index
    %1 = vector.load %arg3[%c0_1, %c0_2] : memref<16x32xf32, #tpu.memory_space<vmem>>, vector<16x16xf32>
    %c0_3 = arith.constant 0 : index
    %c16 = arith.constant 16 : index
    %2 = vector.load %arg3[%c0_3, %c16] : memref<16x32xf32, #tpu.memory_space<vmem>>, vector<16x16xf32>
    %3 = vector.extract_strided_slice %0 {offsets = [0, 0], sizes = [16, 16], strides = [1, 1]} : vector<16x32xf32> to vector<16x16xf32>
    %4 = vector.extract_strided_slice %0 {offsets = [0, 16], sizes = [16, 16], strides = [1, 1]} : vector<16x32xf32> to vector<16x16xf32>
    %5 = arith.mulf %3, %2 : vector<16x16xf32>
    %6 = arith.mulf %4, %1 : vector<16x16xf32>
    %7 = arith.subf %5, %6 : vector<16x16xf32>
    %8 = arith.mulf %4, %2 : vector<16x16xf32>
    %9 = arith.mulf %3, %1 : vector<16x16xf32>
    %10 = arith.addf %8, %9 : vector<16x16xf32>
    %11 = tpu.concatenate %7, %10 in 1 : vector<16x16xf32>, vector<16x16xf32> -> vector<16x32xf32>
    %c0_4 = arith.constant 0 : index
    %c0_5 = arith.constant 0 : index
    %12 = vector.load %arg2[%c0_4, %c0_5] : memref<16x16xf32, #tpu.memory_space<vmem>>, vector<16x16xf32>
    %c0_6 = arith.constant 0 : index
    %c228 = arith.constant 228 : index
    %c0_7 = arith.constant 0 : index
    %13 = vector.load %arg4[%c0_6, %c228, %c0_7] : memref<2x232x128xf32, #tpu.memory_space<vmem>>, vector<1x1x32xf32>
    %14 = vector.shape_cast %13 : vector<1x1x32xf32> to vector<1x32xf32>
    %15 = arith.mulf %11, %11 : vector<16x32xf32>
    %cst = arith.constant dense<0.000000e+00> : vector<16xf32>
    %16 = vector.multi_reduction <add>, %15, %cst [1] : vector<16x32xf32> to vector<16xf32>
    %17 = vector.shape_cast %16 : vector<16xf32> to vector<16x1xf32>
    %cst_8 = arith.constant 3.200000e+01 : f32
    %18 = vector.broadcast %cst_8 : f32 to vector<16x1xf32>
    %19 = arith.divf %17, %18 : vector<16x1xf32>
    %cst_9 = arith.constant 9.99999997E-7 : f32
    %20 = vector.broadcast %cst_9 : f32 to vector<16x1xf32>
    %21 = arith.addf %19, %20 : vector<16x1xf32>
    %22 = math.rsqrt %21 : vector<16x1xf32>
    %23 = vector.broadcast %22 : vector<16x1xf32> to vector<16x32xf32>
    %24 = arith.mulf %11, %23 : vector<16x32xf32>
    %25 = vector.broadcast %14 : vector<1x32xf32> to vector<16x32xf32>
    %26 = arith.mulf %24, %25 : vector<16x32xf32>
    %c0_10 = arith.constant 0 : index
    %c0_11 = arith.constant 0 : index
    %c0_12 = arith.constant 0 : index
    %27 = vector.load %arg4[%c0_10, %c0_11, %c0_12] : memref<2x232x128xf32, #tpu.memory_space<vmem>>, vector<1x32x96xf32>
    %28 = vector.shape_cast %27 : vector<1x32x96xf32> to vector<32x96xf32>
    %c0_13 = arith.constant 0 : index
    %c224 = arith.constant 224 : index
    %c0_14 = arith.constant 0 : index
    %29 = vector.load %arg4[%c0_13, %c224, %c0_14] : memref<2x232x128xf32, #tpu.memory_space<vmem>>, vector<1x1x96xf32>
    %30 = vector.shape_cast %29 : vector<1x1x96xf32> to vector<1x96xf32>
    %cst_15 = arith.constant dense<0.000000e+00> : vector<16x96xf32>
    %31 = tpu.matmul %26, %28, %cst_15 {dimension_numbers = #tpu.dot_dimension_numbers<[1], [0], [0], [1], [0, 0, 1, 1], [], []>} : vector<16x32xf32>, vector<32x96xf32>, vector<16x96xf32> -> vector<16x96xf32>
    %32 = vector.broadcast %30 : vector<1x96xf32> to vector<16x96xf32>
    %33 = arith.addf %31, %32 : vector<16x96xf32>
    %34 = vector.extract_strided_slice %33 {offsets = [0, 0], sizes = [16, 8], strides = [1, 1]} : vector<16x96xf32> to vector<16x8xf32>
    %35 = vector.extract_strided_slice %33 {offsets = [0, 32], sizes = [16, 8], strides = [1, 1]} : vector<16x96xf32> to vector<16x8xf32>
    %36 = vector.extract_strided_slice %33 {offsets = [0, 64], sizes = [16, 8], strides = [1, 1]} : vector<16x96xf32> to vector<16x8xf32>
    %cst_16 = arith.constant dense<0.000000e+00> : vector<16x16xf32>
    %37 = tpu.matmul %34, %35, %cst_16 {dimension_numbers = #tpu.dot_dimension_numbers<[1], [1], [0], [0], [0, 0, 1, 0], [], []>} : vector<16x8xf32>, vector<16x8xf32>, vector<16x16xf32> -> vector<16x16xf32>
    %38 = arith.addf %37, %12 : vector<16x16xf32>
    %cst_17 = arith.constant dense<0xFF800000> : vector<16xf32>
    %39 = vector.multi_reduction <maximumf>, %38, %cst_17 [1] : vector<16x16xf32> to vector<16xf32>
    %40 = vector.shape_cast %39 : vector<16xf32> to vector<16x1xf32>
    %41 = vector.broadcast %40 : vector<16x1xf32> to vector<16x16xf32>
    %42 = arith.subf %38, %41 : vector<16x16xf32>
    %43 = math.exp %42 : vector<16x16xf32>
    %cst_18 = arith.constant dense<0.000000e+00> : vector<16xf32>
    %44 = vector.multi_reduction <add>, %43, %cst_18 [1] : vector<16x16xf32> to vector<16xf32>
    %45 = vector.shape_cast %44 : vector<16xf32> to vector<16x1xf32>
    %46 = tpu.reciprocal %45 {approx = true} : vector<16x1xf32> -> vector<16x1xf32>
    %47 = vector.broadcast %46 : vector<16x1xf32> to vector<16x16xf32>
    %48 = arith.mulf %43, %47 : vector<16x16xf32>
    %cst_19 = arith.constant dense<0.000000e+00> : vector<16x8xf32>
    %49 = tpu.matmul %48, %36, %cst_19 {dimension_numbers = #tpu.dot_dimension_numbers<[1], [0], [0], [1], [0, 0, 1, 1], [], []>} : vector<16x16xf32>, vector<16x8xf32>, vector<16x8xf32> -> vector<16x8xf32>
    %50 = vector.extract_strided_slice %33 {offsets = [0, 8], sizes = [16, 8], strides = [1, 1]} : vector<16x96xf32> to vector<16x8xf32>
    %51 = vector.extract_strided_slice %33 {offsets = [0, 40], sizes = [16, 8], strides = [1, 1]} : vector<16x96xf32> to vector<16x8xf32>
    %52 = vector.extract_strided_slice %33 {offsets = [0, 72], sizes = [16, 8], strides = [1, 1]} : vector<16x96xf32> to vector<16x8xf32>
    %cst_20 = arith.constant dense<0.000000e+00> : vector<16x16xf32>
    %53 = tpu.matmul %50, %51, %cst_20 {dimension_numbers = #tpu.dot_dimension_numbers<[1], [1], [0], [0], [0, 0, 1, 0], [], []>} : vector<16x8xf32>, vector<16x8xf32>, vector<16x16xf32> -> vector<16x16xf32>
    %54 = arith.addf %53, %12 : vector<16x16xf32>
    %cst_21 = arith.constant dense<0xFF800000> : vector<16xf32>
    %55 = vector.multi_reduction <maximumf>, %54, %cst_21 [1] : vector<16x16xf32> to vector<16xf32>
    %56 = vector.shape_cast %55 : vector<16xf32> to vector<16x1xf32>
    %57 = vector.broadcast %56 : vector<16x1xf32> to vector<16x16xf32>
    %58 = arith.subf %54, %57 : vector<16x16xf32>
    %59 = math.exp %58 : vector<16x16xf32>
    %cst_22 = arith.constant dense<0.000000e+00> : vector<16xf32>
    %60 = vector.multi_reduction <add>, %59, %cst_22 [1] : vector<16x16xf32> to vector<16xf32>
    %61 = vector.shape_cast %60 : vector<16xf32> to vector<16x1xf32>
    %62 = tpu.reciprocal %61 {approx = true} : vector<16x1xf32> -> vector<16x1xf32>
    %63 = vector.broadcast %62 : vector<16x1xf32> to vector<16x16xf32>
    %64 = arith.mulf %59, %63 : vector<16x16xf32>
    %cst_23 = arith.constant dense<0.000000e+00> : vector<16x8xf32>
    %65 = tpu.matmul %64, %52, %cst_23 {dimension_numbers = #tpu.dot_dimension_numbers<[1], [0], [0], [1], [0, 0, 1, 1], [], []>} : vector<16x16xf32>, vector<16x8xf32>, vector<16x8xf32> -> vector<16x8xf32>
    %66 = vector.extract_strided_slice %33 {offsets = [0, 16], sizes = [16, 8], strides = [1, 1]} : vector<16x96xf32> to vector<16x8xf32>
    %67 = vector.extract_strided_slice %33 {offsets = [0, 48], sizes = [16, 8], strides = [1, 1]} : vector<16x96xf32> to vector<16x8xf32>
    %68 = vector.extract_strided_slice %33 {offsets = [0, 80], sizes = [16, 8], strides = [1, 1]} : vector<16x96xf32> to vector<16x8xf32>
    %cst_24 = arith.constant dense<0.000000e+00> : vector<16x16xf32>
    %69 = tpu.matmul %66, %67, %cst_24 {dimension_numbers = #tpu.dot_dimension_numbers<[1], [1], [0], [0], [0, 0, 1, 0], [], []>} : vector<16x8xf32>, vector<16x8xf32>, vector<16x16xf32> -> vector<16x16xf32>
    %70 = arith.addf %69, %12 : vector<16x16xf32>
    %cst_25 = arith.constant dense<0xFF800000> : vector<16xf32>
    %71 = vector.multi_reduction <maximumf>, %70, %cst_25 [1] : vector<16x16xf32> to vector<16xf32>
    %72 = vector.shape_cast %71 : vector<16xf32> to vector<16x1xf32>
    %73 = vector.broadcast %72 : vector<16x1xf32> to vector<16x16xf32>
    %74 = arith.subf %70, %73 : vector<16x16xf32>
    %75 = math.exp %74 : vector<16x16xf32>
    %cst_26 = arith.constant dense<0.000000e+00> : vector<16xf32>
    %76 = vector.multi_reduction <add>, %75, %cst_26 [1] : vector<16x16xf32> to vector<16xf32>
    %77 = vector.shape_cast %76 : vector<16xf32> to vector<16x1xf32>
    %78 = tpu.reciprocal %77 {approx = true} : vector<16x1xf32> -> vector<16x1xf32>
    %79 = vector.broadcast %78 : vector<16x1xf32> to vector<16x16xf32>
    %80 = arith.mulf %75, %79 : vector<16x16xf32>
    %cst_27 = arith.constant dense<0.000000e+00> : vector<16x8xf32>
    %81 = tpu.matmul %80, %68, %cst_27 {dimension_numbers = #tpu.dot_dimension_numbers<[1], [0], [0], [1], [0, 0, 1, 1], [], []>} : vector<16x16xf32>, vector<16x8xf32>, vector<16x8xf32> -> vector<16x8xf32>
    %82 = vector.extract_strided_slice %33 {offsets = [0, 24], sizes = [16, 8], strides = [1, 1]} : vector<16x96xf32> to vector<16x8xf32>
    %83 = vector.extract_strided_slice %33 {offsets = [0, 56], sizes = [16, 8], strides = [1, 1]} : vector<16x96xf32> to vector<16x8xf32>
    %84 = vector.extract_strided_slice %33 {offsets = [0, 88], sizes = [16, 8], strides = [1, 1]} : vector<16x96xf32> to vector<16x8xf32>
    %cst_28 = arith.constant dense<0.000000e+00> : vector<16x16xf32>
    %85 = tpu.matmul %82, %83, %cst_28 {dimension_numbers = #tpu.dot_dimension_numbers<[1], [1], [0], [0], [0, 0, 1, 0], [], []>} : vector<16x8xf32>, vector<16x8xf32>, vector<16x16xf32> -> vector<16x16xf32>
    %86 = arith.addf %85, %12 : vector<16x16xf32>
    %cst_29 = arith.constant dense<0xFF800000> : vector<16xf32>
    %87 = vector.multi_reduction <maximumf>, %86, %cst_29 [1] : vector<16x16xf32> to vector<16xf32>
    %88 = vector.shape_cast %87 : vector<16xf32> to vector<16x1xf32>
    %89 = vector.broadcast %88 : vector<16x1xf32> to vector<16x16xf32>
    %90 = arith.subf %86, %89 : vector<16x16xf32>
    %91 = math.exp %90 : vector<16x16xf32>
    %cst_30 = arith.constant dense<0.000000e+00> : vector<16xf32>
    %92 = vector.multi_reduction <add>, %91, %cst_30 [1] : vector<16x16xf32> to vector<16xf32>
    %93 = vector.shape_cast %92 : vector<16xf32> to vector<16x1xf32>
    %94 = tpu.reciprocal %93 {approx = true} : vector<16x1xf32> -> vector<16x1xf32>
    %95 = vector.broadcast %94 : vector<16x1xf32> to vector<16x16xf32>
    %96 = arith.mulf %91, %95 : vector<16x16xf32>
    %cst_31 = arith.constant dense<0.000000e+00> : vector<16x8xf32>
    %97 = tpu.matmul %96, %84, %cst_31 {dimension_numbers = #tpu.dot_dimension_numbers<[1], [0], [0], [1], [0, 0, 1, 1], [], []>} : vector<16x16xf32>, vector<16x8xf32>, vector<16x8xf32> -> vector<16x8xf32>
    %98 = tpu.concatenate %49, %65, %81, %97 in 1 : vector<16x8xf32>, vector<16x8xf32>, vector<16x8xf32>, vector<16x8xf32> -> vector<16x32xf32>
    %c0_32 = arith.constant 0 : index
    %c32 = arith.constant 32 : index
    %c0_33 = arith.constant 0 : index
    %99 = vector.load %arg4[%c0_32, %c32, %c0_33] : memref<2x232x128xf32, #tpu.memory_space<vmem>>, vector<1x32x32xf32>
    %100 = vector.shape_cast %99 : vector<1x32x32xf32> to vector<32x32xf32>
    %c0_34 = arith.constant 0 : index
    %c225 = arith.constant 225 : index
    %c0_35 = arith.constant 0 : index
    %101 = vector.load %arg4[%c0_34, %c225, %c0_35] : memref<2x232x128xf32, #tpu.memory_space<vmem>>, vector<1x1x32xf32>
    %102 = vector.shape_cast %101 : vector<1x1x32xf32> to vector<1x32xf32>
    %cst_36 = arith.constant dense<0.000000e+00> : vector<16x32xf32>
    %103 = tpu.matmul %98, %100, %cst_36 {dimension_numbers = #tpu.dot_dimension_numbers<[1], [0], [0], [1], [0, 0, 1, 1], [], []>} : vector<16x32xf32>, vector<32x32xf32>, vector<16x32xf32> -> vector<16x32xf32>
    %104 = arith.addf %11, %103 : vector<16x32xf32>
    %105 = vector.broadcast %102 : vector<1x32xf32> to vector<16x32xf32>
    %106 = arith.addf %104, %105 : vector<16x32xf32>
    %c0_37 = arith.constant 0 : index
    %c229 = arith.constant 229 : index
    %c0_38 = arith.constant 0 : index
    %107 = vector.load %arg4[%c0_37, %c229, %c0_38] : memref<2x232x128xf32, #tpu.memory_space<vmem>>, vector<1x1x32xf32>
    %108 = vector.shape_cast %107 : vector<1x1x32xf32> to vector<1x32xf32>
    %109 = arith.mulf %106, %106 : vector<16x32xf32>
    %cst_39 = arith.constant dense<0.000000e+00> : vector<16xf32>
    %110 = vector.multi_reduction <add>, %109, %cst_39 [1] : vector<16x32xf32> to vector<16xf32>
    %111 = vector.shape_cast %110 : vector<16xf32> to vector<16x1xf32>
    %cst_40 = arith.constant 3.200000e+01 : f32
    %112 = vector.broadcast %cst_40 : f32 to vector<16x1xf32>
    %113 = arith.divf %111, %112 : vector<16x1xf32>
    %cst_41 = arith.constant 9.99999997E-7 : f32
    %114 = vector.broadcast %cst_41 : f32 to vector<16x1xf32>
    %115 = arith.addf %113, %114 : vector<16x1xf32>
    %116 = math.rsqrt %115 : vector<16x1xf32>
    %117 = vector.broadcast %116 : vector<16x1xf32> to vector<16x32xf32>
    %118 = arith.mulf %106, %117 : vector<16x32xf32>
    %119 = vector.broadcast %108 : vector<1x32xf32> to vector<16x32xf32>
    %120 = arith.mulf %118, %119 : vector<16x32xf32>
    %c0_42 = arith.constant 0 : index
    %c64 = arith.constant 64 : index
    %c0_43 = arith.constant 0 : index
    %121 = vector.load %arg4[%c0_42, %c64, %c0_43] : memref<2x232x128xf32, #tpu.memory_space<vmem>>, vector<1x32x128xf32>
    %122 = vector.shape_cast %121 : vector<1x32x128xf32> to vector<32x128xf32>
    %c0_44 = arith.constant 0 : index
    %c226 = arith.constant 226 : index
    %c0_45 = arith.constant 0 : index
    %123 = vector.load %arg4[%c0_44, %c226, %c0_45] : memref<2x232x128xf32, #tpu.memory_space<vmem>>, vector<1x1x128xf32>
    %124 = vector.shape_cast %123 : vector<1x1x128xf32> to vector<1x128xf32>
    %c0_46 = arith.constant 0 : index
    %c96 = arith.constant 96 : index
    %c0_47 = arith.constant 0 : index
    %125 = vector.load %arg4[%c0_46, %c96, %c0_47] : memref<2x232x128xf32, #tpu.memory_space<vmem>>, vector<1x128x32xf32>
    %126 = vector.shape_cast %125 : vector<1x128x32xf32> to vector<128x32xf32>
    %c0_48 = arith.constant 0 : index
    %c227 = arith.constant 227 : index
    %c0_49 = arith.constant 0 : index
    %127 = vector.load %arg4[%c0_48, %c227, %c0_49] : memref<2x232x128xf32, #tpu.memory_space<vmem>>, vector<1x1x32xf32>
    %128 = vector.shape_cast %127 : vector<1x1x32xf32> to vector<1x32xf32>
    %cst_50 = arith.constant dense<0.000000e+00> : vector<16x128xf32>
    %129 = tpu.matmul %120, %122, %cst_50 {dimension_numbers = #tpu.dot_dimension_numbers<[1], [0], [0], [1], [0, 0, 1, 1], [], []>} : vector<16x32xf32>, vector<32x128xf32>, vector<16x128xf32> -> vector<16x128xf32>
    %130 = vector.broadcast %124 : vector<1x128xf32> to vector<16x128xf32>
    %131 = arith.addf %129, %130 : vector<16x128xf32>
    %cst_51 = arith.constant 0.000000e+00 : f32
    %132 = vector.broadcast %cst_51 : f32 to vector<16x128xf32>
    %133 = arith.maximumf %131, %132 : vector<16x128xf32>
    %cst_52 = arith.constant dense<0.000000e+00> : vector<16x32xf32>
    %134 = tpu.matmul %133, %126, %cst_52 {dimension_numbers = #tpu.dot_dimension_numbers<[1], [0], [0], [1], [0, 0, 1, 1], [], []>} : vector<16x128xf32>, vector<128x32xf32>, vector<16x32xf32> -> vector<16x32xf32>
    %135 = arith.addf %106, %134 : vector<16x32xf32>
    %136 = vector.broadcast %128 : vector<1x32xf32> to vector<16x32xf32>
    %137 = arith.addf %135, %136 : vector<16x32xf32>
    %c1 = arith.constant 1 : index
    %c228_53 = arith.constant 228 : index
    %c0_54 = arith.constant 0 : index
    %138 = vector.load %arg4[%c1, %c228_53, %c0_54] : memref<2x232x128xf32, #tpu.memory_space<vmem>>, vector<1x1x32xf32>
    %139 = vector.shape_cast %138 : vector<1x1x32xf32> to vector<1x32xf32>
    %140 = arith.mulf %137, %137 : vector<16x32xf32>
    %cst_55 = arith.constant dense<0.000000e+00> : vector<16xf32>
    %141 = vector.multi_reduction <add>, %140, %cst_55 [1] : vector<16x32xf32> to vector<16xf32>
    %142 = vector.shape_cast %141 : vector<16xf32> to vector<16x1xf32>
    %cst_56 = arith.constant 3.200000e+01 : f32
    %143 = vector.broadcast %cst_56 : f32 to vector<16x1xf32>
    %144 = arith.divf %142, %143 : vector<16x1xf32>
    %cst_57 = arith.constant 9.99999997E-7 : f32
    %145 = vector.broadcast %cst_57 : f32 to vector<16x1xf32>
    %146 = arith.addf %144, %145 : vector<16x1xf32>
    %147 = math.rsqrt %146 : vector<16x1xf32>
    %148 = vector.broadcast %147 : vector<16x1xf32> to vector<16x32xf32>
    %149 = arith.mulf %137, %148 : vector<16x32xf32>
    %150 = vector.broadcast %139 : vector<1x32xf32> to vector<16x32xf32>
    %151 = arith.mulf %149, %150 : vector<16x32xf32>
    %c1_58 = arith.constant 1 : index
    %c0_59 = arith.constant 0 : index
    %c0_60 = arith.constant 0 : index
    %152 = vector.load %arg4[%c1_58, %c0_59, %c0_60] : memref<2x232x128xf32, #tpu.memory_space<vmem>>, vector<1x32x96xf32>
    %153 = vector.shape_cast %152 : vector<1x32x96xf32> to vector<32x96xf32>
    %c1_61 = arith.constant 1 : index
    %c224_62 = arith.constant 224 : index
    %c0_63 = arith.constant 0 : index
    %154 = vector.load %arg4[%c1_61, %c224_62, %c0_63] : memref<2x232x128xf32, #tpu.memory_space<vmem>>, vector<1x1x96xf32>
    %155 = vector.shape_cast %154 : vector<1x1x96xf32> to vector<1x96xf32>
    %cst_64 = arith.constant dense<0.000000e+00> : vector<16x96xf32>
    %156 = tpu.matmul %151, %153, %cst_64 {dimension_numbers = #tpu.dot_dimension_numbers<[1], [0], [0], [1], [0, 0, 1, 1], [], []>} : vector<16x32xf32>, vector<32x96xf32>, vector<16x96xf32> -> vector<16x96xf32>
    %157 = vector.broadcast %155 : vector<1x96xf32> to vector<16x96xf32>
    %158 = arith.addf %156, %157 : vector<16x96xf32>
    %159 = vector.extract_strided_slice %158 {offsets = [0, 0], sizes = [16, 8], strides = [1, 1]} : vector<16x96xf32> to vector<16x8xf32>
    %160 = vector.extract_strided_slice %158 {offsets = [0, 32], sizes = [16, 8], strides = [1, 1]} : vector<16x96xf32> to vector<16x8xf32>
    %161 = vector.extract_strided_slice %158 {offsets = [0, 64], sizes = [16, 8], strides = [1, 1]} : vector<16x96xf32> to vector<16x8xf32>
    %cst_65 = arith.constant dense<0.000000e+00> : vector<16x16xf32>
    %162 = tpu.matmul %159, %160, %cst_65 {dimension_numbers = #tpu.dot_dimension_numbers<[1], [1], [0], [0], [0, 0, 1, 0], [], []>} : vector<16x8xf32>, vector<16x8xf32>, vector<16x16xf32> -> vector<16x16xf32>
    %163 = arith.addf %162, %12 : vector<16x16xf32>
    %cst_66 = arith.constant dense<0xFF800000> : vector<16xf32>
    %164 = vector.multi_reduction <maximumf>, %163, %cst_66 [1] : vector<16x16xf32> to vector<16xf32>
    %165 = vector.shape_cast %164 : vector<16xf32> to vector<16x1xf32>
    %166 = vector.broadcast %165 : vector<16x1xf32> to vector<16x16xf32>
    %167 = arith.subf %163, %166 : vector<16x16xf32>
    %168 = math.exp %167 : vector<16x16xf32>
    %cst_67 = arith.constant dense<0.000000e+00> : vector<16xf32>
    %169 = vector.multi_reduction <add>, %168, %cst_67 [1] : vector<16x16xf32> to vector<16xf32>
    %170 = vector.shape_cast %169 : vector<16xf32> to vector<16x1xf32>
    %171 = tpu.reciprocal %170 {approx = true} : vector<16x1xf32> -> vector<16x1xf32>
    %172 = vector.broadcast %171 : vector<16x1xf32> to vector<16x16xf32>
    %173 = arith.mulf %168, %172 : vector<16x16xf32>
    %cst_68 = arith.constant dense<0.000000e+00> : vector<16x8xf32>
    %174 = tpu.matmul %173, %161, %cst_68 {dimension_numbers = #tpu.dot_dimension_numbers<[1], [0], [0], [1], [0, 0, 1, 1], [], []>} : vector<16x16xf32>, vector<16x8xf32>, vector<16x8xf32> -> vector<16x8xf32>
    %175 = vector.extract_strided_slice %158 {offsets = [0, 8], sizes = [16, 8], strides = [1, 1]} : vector<16x96xf32> to vector<16x8xf32>
    %176 = vector.extract_strided_slice %158 {offsets = [0, 40], sizes = [16, 8], strides = [1, 1]} : vector<16x96xf32> to vector<16x8xf32>
    %177 = vector.extract_strided_slice %158 {offsets = [0, 72], sizes = [16, 8], strides = [1, 1]} : vector<16x96xf32> to vector<16x8xf32>
    %cst_69 = arith.constant dense<0.000000e+00> : vector<16x16xf32>
    %178 = tpu.matmul %175, %176, %cst_69 {dimension_numbers = #tpu.dot_dimension_numbers<[1], [1], [0], [0], [0, 0, 1, 0], [], []>} : vector<16x8xf32>, vector<16x8xf32>, vector<16x16xf32> -> vector<16x16xf32>
    %179 = arith.addf %178, %12 : vector<16x16xf32>
    %cst_70 = arith.constant dense<0xFF800000> : vector<16xf32>
    %180 = vector.multi_reduction <maximumf>, %179, %cst_70 [1] : vector<16x16xf32> to vector<16xf32>
    %181 = vector.shape_cast %180 : vector<16xf32> to vector<16x1xf32>
    %182 = vector.broadcast %181 : vector<16x1xf32> to vector<16x16xf32>
    %183 = arith.subf %179, %182 : vector<16x16xf32>
    %184 = math.exp %183 : vector<16x16xf32>
    %cst_71 = arith.constant dense<0.000000e+00> : vector<16xf32>
    %185 = vector.multi_reduction <add>, %184, %cst_71 [1] : vector<16x16xf32> to vector<16xf32>
    %186 = vector.shape_cast %185 : vector<16xf32> to vector<16x1xf32>
    %187 = tpu.reciprocal %186 {approx = true} : vector<16x1xf32> -> vector<16x1xf32>
    %188 = vector.broadcast %187 : vector<16x1xf32> to vector<16x16xf32>
    %189 = arith.mulf %184, %188 : vector<16x16xf32>
    %cst_72 = arith.constant dense<0.000000e+00> : vector<16x8xf32>
    %190 = tpu.matmul %189, %177, %cst_72 {dimension_numbers = #tpu.dot_dimension_numbers<[1], [0], [0], [1], [0, 0, 1, 1], [], []>} : vector<16x16xf32>, vector<16x8xf32>, vector<16x8xf32> -> vector<16x8xf32>
    %191 = vector.extract_strided_slice %158 {offsets = [0, 16], sizes = [16, 8], strides = [1, 1]} : vector<16x96xf32> to vector<16x8xf32>
    %192 = vector.extract_strided_slice %158 {offsets = [0, 48], sizes = [16, 8], strides = [1, 1]} : vector<16x96xf32> to vector<16x8xf32>
    %193 = vector.extract_strided_slice %158 {offsets = [0, 80], sizes = [16, 8], strides = [1, 1]} : vector<16x96xf32> to vector<16x8xf32>
    %cst_73 = arith.constant dense<0.000000e+00> : vector<16x16xf32>
    %194 = tpu.matmul %191, %192, %cst_73 {dimension_numbers = #tpu.dot_dimension_numbers<[1], [1], [0], [0], [0, 0, 1, 0], [], []>} : vector<16x8xf32>, vector<16x8xf32>, vector<16x16xf32> -> vector<16x16xf32>
    %195 = arith.addf %194, %12 : vector<16x16xf32>
    %cst_74 = arith.constant dense<0xFF800000> : vector<16xf32>
    %196 = vector.multi_reduction <maximumf>, %195, %cst_74 [1] : vector<16x16xf32> to vector<16xf32>
    %197 = vector.shape_cast %196 : vector<16xf32> to vector<16x1xf32>
    %198 = vector.broadcast %197 : vector<16x1xf32> to vector<16x16xf32>
    %199 = arith.subf %195, %198 : vector<16x16xf32>
    %200 = math.exp %199 : vector<16x16xf32>
    %cst_75 = arith.constant dense<0.000000e+00> : vector<16xf32>
    %201 = vector.multi_reduction <add>, %200, %cst_75 [1] : vector<16x16xf32> to vector<16xf32>
    %202 = vector.shape_cast %201 : vector<16xf32> to vector<16x1xf32>
    %203 = tpu.reciprocal %202 {approx = true} : vector<16x1xf32> -> vector<16x1xf32>
    %204 = vector.broadcast %203 : vector<16x1xf32> to vector<16x16xf32>
    %205 = arith.mulf %200, %204 : vector<16x16xf32>
    %cst_76 = arith.constant dense<0.000000e+00> : vector<16x8xf32>
    %206 = tpu.matmul %205, %193, %cst_76 {dimension_numbers = #tpu.dot_dimension_numbers<[1], [0], [0], [1], [0, 0, 1, 1], [], []>} : vector<16x16xf32>, vector<16x8xf32>, vector<16x8xf32> -> vector<16x8xf32>
    %207 = vector.extract_strided_slice %158 {offsets = [0, 24], sizes = [16, 8], strides = [1, 1]} : vector<16x96xf32> to vector<16x8xf32>
    %208 = vector.extract_strided_slice %158 {offsets = [0, 56], sizes = [16, 8], strides = [1, 1]} : vector<16x96xf32> to vector<16x8xf32>
    %209 = vector.extract_strided_slice %158 {offsets = [0, 88], sizes = [16, 8], strides = [1, 1]} : vector<16x96xf32> to vector<16x8xf32>
    %cst_77 = arith.constant dense<0.000000e+00> : vector<16x16xf32>
    %210 = tpu.matmul %207, %208, %cst_77 {dimension_numbers = #tpu.dot_dimension_numbers<[1], [1], [0], [0], [0, 0, 1, 0], [], []>} : vector<16x8xf32>, vector<16x8xf32>, vector<16x16xf32> -> vector<16x16xf32>
    %211 = arith.addf %210, %12 : vector<16x16xf32>
    %cst_78 = arith.constant dense<0xFF800000> : vector<16xf32>
    %212 = vector.multi_reduction <maximumf>, %211, %cst_78 [1] : vector<16x16xf32> to vector<16xf32>
    %213 = vector.shape_cast %212 : vector<16xf32> to vector<16x1xf32>
    %214 = vector.broadcast %213 : vector<16x1xf32> to vector<16x16xf32>
    %215 = arith.subf %211, %214 : vector<16x16xf32>
    %216 = math.exp %215 : vector<16x16xf32>
    %cst_79 = arith.constant dense<0.000000e+00> : vector<16xf32>
    %217 = vector.multi_reduction <add>, %216, %cst_79 [1] : vector<16x16xf32> to vector<16xf32>
    %218 = vector.shape_cast %217 : vector<16xf32> to vector<16x1xf32>
    %219 = tpu.reciprocal %218 {approx = true} : vector<16x1xf32> -> vector<16x1xf32>
    %220 = vector.broadcast %219 : vector<16x1xf32> to vector<16x16xf32>
    %221 = arith.mulf %216, %220 : vector<16x16xf32>
    %cst_80 = arith.constant dense<0.000000e+00> : vector<16x8xf32>
    %222 = tpu.matmul %221, %209, %cst_80 {dimension_numbers = #tpu.dot_dimension_numbers<[1], [0], [0], [1], [0, 0, 1, 1], [], []>} : vector<16x16xf32>, vector<16x8xf32>, vector<16x8xf32> -> vector<16x8xf32>
    %223 = tpu.concatenate %174, %190, %206, %222 in 1 : vector<16x8xf32>, vector<16x8xf32>, vector<16x8xf32>, vector<16x8xf32> -> vector<16x32xf32>
    %c1_81 = arith.constant 1 : index
    %c32_82 = arith.constant 32 : index
    %c0_83 = arith.constant 0 : index
    %224 = vector.load %arg4[%c1_81, %c32_82, %c0_83] : memref<2x232x128xf32, #tpu.memory_space<vmem>>, vector<1x32x32xf32>
    %225 = vector.shape_cast %224 : vector<1x32x32xf32> to vector<32x32xf32>
    %c1_84 = arith.constant 1 : index
    %c225_85 = arith.constant 225 : index
    %c0_86 = arith.constant 0 : index
    %226 = vector.load %arg4[%c1_84, %c225_85, %c0_86] : memref<2x232x128xf32, #tpu.memory_space<vmem>>, vector<1x1x32xf32>
    %227 = vector.shape_cast %226 : vector<1x1x32xf32> to vector<1x32xf32>
    %cst_87 = arith.constant dense<0.000000e+00> : vector<16x32xf32>
    %228 = tpu.matmul %223, %225, %cst_87 {dimension_numbers = #tpu.dot_dimension_numbers<[1], [0], [0], [1], [0, 0, 1, 1], [], []>} : vector<16x32xf32>, vector<32x32xf32>, vector<16x32xf32> -> vector<16x32xf32>
    %229 = arith.addf %137, %228 : vector<16x32xf32>
    %230 = vector.broadcast %227 : vector<1x32xf32> to vector<16x32xf32>
    %231 = arith.addf %229, %230 : vector<16x32xf32>
    %c1_88 = arith.constant 1 : index
    %c229_89 = arith.constant 229 : index
    %c0_90 = arith.constant 0 : index
    %232 = vector.load %arg4[%c1_88, %c229_89, %c0_90] : memref<2x232x128xf32, #tpu.memory_space<vmem>>, vector<1x1x32xf32>
    %233 = vector.shape_cast %232 : vector<1x1x32xf32> to vector<1x32xf32>
    %234 = arith.mulf %231, %231 : vector<16x32xf32>
    %cst_91 = arith.constant dense<0.000000e+00> : vector<16xf32>
    %235 = vector.multi_reduction <add>, %234, %cst_91 [1] : vector<16x32xf32> to vector<16xf32>
    %236 = vector.shape_cast %235 : vector<16xf32> to vector<16x1xf32>
    %cst_92 = arith.constant 3.200000e+01 : f32
    %237 = vector.broadcast %cst_92 : f32 to vector<16x1xf32>
    %238 = arith.divf %236, %237 : vector<16x1xf32>
    %cst_93 = arith.constant 9.99999997E-7 : f32
    %239 = vector.broadcast %cst_93 : f32 to vector<16x1xf32>
    %240 = arith.addf %238, %239 : vector<16x1xf32>
    %241 = math.rsqrt %240 : vector<16x1xf32>
    %242 = vector.broadcast %241 : vector<16x1xf32> to vector<16x32xf32>
    %243 = arith.mulf %231, %242 : vector<16x32xf32>
    %244 = vector.broadcast %233 : vector<1x32xf32> to vector<16x32xf32>
    %245 = arith.mulf %243, %244 : vector<16x32xf32>
    %c1_94 = arith.constant 1 : index
    %c64_95 = arith.constant 64 : index
    %c0_96 = arith.constant 0 : index
    %246 = vector.load %arg4[%c1_94, %c64_95, %c0_96] : memref<2x232x128xf32, #tpu.memory_space<vmem>>, vector<1x32x128xf32>
    %247 = vector.shape_cast %246 : vector<1x32x128xf32> to vector<32x128xf32>
    %c1_97 = arith.constant 1 : index
    %c226_98 = arith.constant 226 : index
    %c0_99 = arith.constant 0 : index
    %248 = vector.load %arg4[%c1_97, %c226_98, %c0_99] : memref<2x232x128xf32, #tpu.memory_space<vmem>>, vector<1x1x128xf32>
    %249 = vector.shape_cast %248 : vector<1x1x128xf32> to vector<1x128xf32>
    %c1_100 = arith.constant 1 : index
    %c96_101 = arith.constant 96 : index
    %c0_102 = arith.constant 0 : index
    %250 = vector.load %arg4[%c1_100, %c96_101, %c0_102] : memref<2x232x128xf32, #tpu.memory_space<vmem>>, vector<1x128x32xf32>
    %251 = vector.shape_cast %250 : vector<1x128x32xf32> to vector<128x32xf32>
    %c1_103 = arith.constant 1 : index
    %c227_104 = arith.constant 227 : index
    %c0_105 = arith.constant 0 : index
    %252 = vector.load %arg4[%c1_103, %c227_104, %c0_105] : memref<2x232x128xf32, #tpu.memory_space<vmem>>, vector<1x1x32xf32>
    %253 = vector.shape_cast %252 : vector<1x1x32xf32> to vector<1x32xf32>
    %cst_106 = arith.constant dense<0.000000e+00> : vector<16x128xf32>
    %254 = tpu.matmul %245, %247, %cst_106 {dimension_numbers = #tpu.dot_dimension_numbers<[1], [0], [0], [1], [0, 0, 1, 1], [], []>} : vector<16x32xf32>, vector<32x128xf32>, vector<16x128xf32> -> vector<16x128xf32>
    %255 = vector.broadcast %249 : vector<1x128xf32> to vector<16x128xf32>
    %256 = arith.addf %254, %255 : vector<16x128xf32>
    %cst_107 = arith.constant 0.000000e+00 : f32
    %257 = vector.broadcast %cst_107 : f32 to vector<16x128xf32>
    %258 = arith.maximumf %256, %257 : vector<16x128xf32>
    %cst_108 = arith.constant dense<0.000000e+00> : vector<16x32xf32>
    %259 = tpu.matmul %258, %251, %cst_108 {dimension_numbers = #tpu.dot_dimension_numbers<[1], [0], [0], [1], [0, 0, 1, 1], [], []>} : vector<16x128xf32>, vector<128x32xf32>, vector<16x32xf32> -> vector<16x32xf32>
    %260 = arith.addf %231, %259 : vector<16x32xf32>
    %261 = vector.broadcast %253 : vector<1x32xf32> to vector<16x32xf32>
    %262 = arith.addf %260, %261 : vector<16x32xf32>
    %c48 = arith.constant 48 : index
    %c0_109 = arith.constant 0 : index
    %263 = vector.load %arg5[%c48, %c0_109] : memref<56x128xf32, #tpu.memory_space<vmem>>, vector<1x32xf32>
    %264 = arith.mulf %262, %262 : vector<16x32xf32>
    %cst_110 = arith.constant dense<0.000000e+00> : vector<16xf32>
    %265 = vector.multi_reduction <add>, %264, %cst_110 [1] : vector<16x32xf32> to vector<16xf32>
    %266 = vector.shape_cast %265 : vector<16xf32> to vector<16x1xf32>
    %cst_111 = arith.constant 3.200000e+01 : f32
    %267 = vector.broadcast %cst_111 : f32 to vector<16x1xf32>
    %268 = arith.divf %266, %267 : vector<16x1xf32>
    %cst_112 = arith.constant 9.99999997E-7 : f32
    %269 = vector.broadcast %cst_112 : f32 to vector<16x1xf32>
    %270 = arith.addf %268, %269 : vector<16x1xf32>
    %271 = math.rsqrt %270 : vector<16x1xf32>
    %272 = vector.broadcast %271 : vector<16x1xf32> to vector<16x32xf32>
    %273 = arith.mulf %262, %272 : vector<16x32xf32>
    %274 = vector.broadcast %263 : vector<1x32xf32> to vector<16x32xf32>
    %275 = arith.mulf %273, %274 : vector<16x32xf32>
    %c49 = arith.constant 49 : index
    %c0_113 = arith.constant 0 : index
    %276 = vector.load %arg5[%c49, %c0_113] : memref<56x128xf32, #tpu.memory_space<vmem>>, vector<1x32xf32>
    %c50 = arith.constant 50 : index
    %c0_114 = arith.constant 0 : index
    %277 = vector.load %arg5[%c50, %c0_114] : memref<56x128xf32, #tpu.memory_space<vmem>>, vector<1x1xf32>
    %278 = vector.extract_strided_slice %275 {offsets = [0, 0], sizes = [8, 32], strides = [1, 1]} : vector<16x32xf32> to vector<8x32xf32>
    %279 = vector.broadcast %276 : vector<1x32xf32> to vector<8x32xf32>
    %280 = arith.mulf %278, %279 : vector<8x32xf32>
    %cst_115 = arith.constant dense<0.000000e+00> : vector<8xf32>
    %281 = vector.multi_reduction <add>, %280, %cst_115 [1] : vector<8x32xf32> to vector<8xf32>
    %282 = vector.shape_cast %281 : vector<8xf32> to vector<8x1xf32>
    %283 = vector.broadcast %277 : vector<1x1xf32> to vector<8x1xf32>
    %284 = arith.addf %282, %283 : vector<8x1xf32>
    %cst_116 = arith.constant dense<0xFF800000> : vector<1xf32>
    %285 = vector.multi_reduction <maximumf>, %284, %cst_116 [0] : vector<8x1xf32> to vector<1xf32>
    %286 = vector.shape_cast %285 : vector<1xf32> to vector<1x1xf32>
    %287 = vector.broadcast %286 : vector<1x1xf32> to vector<8x1xf32>
    %288 = arith.subf %284, %287 : vector<8x1xf32>
    %289 = math.exp %288 : vector<8x1xf32>
    %cst_117 = arith.constant dense<0.000000e+00> : vector<1xf32>
    %290 = vector.multi_reduction <add>, %289, %cst_117 [0] : vector<8x1xf32> to vector<1xf32>
    %291 = vector.shape_cast %290 : vector<1xf32> to vector<1x1xf32>
    %292 = tpu.reciprocal %291 {approx = true} : vector<1x1xf32> -> vector<1x1xf32>
    %293 = vector.broadcast %292 : vector<1x1xf32> to vector<8x1xf32>
    %294 = arith.mulf %289, %293 : vector<8x1xf32>
    %295 = vector.broadcast %294 : vector<8x1xf32> to vector<8x32xf32>
    %296 = arith.mulf %278, %295 : vector<8x32xf32>
    %cst_118 = arith.constant dense<0.000000e+00> : vector<32xf32>
    %297 = vector.multi_reduction <add>, %296, %cst_118 [0] : vector<8x32xf32> to vector<32xf32>
    %298 = vector.shape_cast %297 : vector<32xf32> to vector<1x32xf32>
    %299 = vector.extract_strided_slice %275 {offsets = [8, 0], sizes = [8, 32], strides = [1, 1]} : vector<16x32xf32> to vector<8x32xf32>
    %300 = vector.broadcast %276 : vector<1x32xf32> to vector<8x32xf32>
    %301 = arith.mulf %299, %300 : vector<8x32xf32>
    %cst_119 = arith.constant dense<0.000000e+00> : vector<8xf32>
    %302 = vector.multi_reduction <add>, %301, %cst_119 [1] : vector<8x32xf32> to vector<8xf32>
    %303 = vector.shape_cast %302 : vector<8xf32> to vector<8x1xf32>
    %304 = vector.broadcast %277 : vector<1x1xf32> to vector<8x1xf32>
    %305 = arith.addf %303, %304 : vector<8x1xf32>
    %cst_120 = arith.constant dense<0xFF800000> : vector<1xf32>
    %306 = vector.multi_reduction <maximumf>, %305, %cst_120 [0] : vector<8x1xf32> to vector<1xf32>
    %307 = vector.shape_cast %306 : vector<1xf32> to vector<1x1xf32>
    %308 = vector.broadcast %307 : vector<1x1xf32> to vector<8x1xf32>
    %309 = arith.subf %305, %308 : vector<8x1xf32>
    %310 = math.exp %309 : vector<8x1xf32>
    %cst_121 = arith.constant dense<0.000000e+00> : vector<1xf32>
    %311 = vector.multi_reduction <add>, %310, %cst_121 [0] : vector<8x1xf32> to vector<1xf32>
    %312 = vector.shape_cast %311 : vector<1xf32> to vector<1x1xf32>
    %313 = tpu.reciprocal %312 {approx = true} : vector<1x1xf32> -> vector<1x1xf32>
    %314 = vector.broadcast %313 : vector<1x1xf32> to vector<8x1xf32>
    %315 = arith.mulf %310, %314 : vector<8x1xf32>
    %316 = vector.broadcast %315 : vector<8x1xf32> to vector<8x32xf32>
    %317 = arith.mulf %299, %316 : vector<8x32xf32>
    %cst_122 = arith.constant dense<0.000000e+00> : vector<32xf32>
    %318 = vector.multi_reduction <add>, %317, %cst_122 [0] : vector<8x32xf32> to vector<32xf32>
    %319 = vector.shape_cast %318 : vector<32xf32> to vector<1x32xf32>
    %320 = tpu.concatenate %298, %319 in 0 : vector<1x32xf32>, vector<1x32xf32> -> vector<2x32xf32>
    %c0_123 = arith.constant 0 : index
    %c0_124 = arith.constant 0 : index
    %321 = vector.load %arg5[%c0_123, %c0_124] : memref<56x128xf32, #tpu.memory_space<vmem>>, vector<32x16xf32>
    %c51 = arith.constant 51 : index
    %c0_125 = arith.constant 0 : index
    %322 = vector.load %arg5[%c51, %c0_125] : memref<56x128xf32, #tpu.memory_space<vmem>>, vector<1x16xf32>
    %c32_126 = arith.constant 32 : index
    %c0_127 = arith.constant 0 : index
    %323 = vector.load %arg5[%c32_126, %c0_127] : memref<56x128xf32, #tpu.memory_space<vmem>>, vector<16x128xf32>
    %c52 = arith.constant 52 : index
    %c0_128 = arith.constant 0 : index
    %324 = vector.load %arg5[%c52, %c0_128] : memref<56x128xf32, #tpu.memory_space<vmem>>, vector<1x128xf32>
    %cst_129 = arith.constant dense<0.000000e+00> : vector<2x16xf32>
    %325 = tpu.matmul %320, %321, %cst_129 {dimension_numbers = #tpu.dot_dimension_numbers<[1], [0], [0], [1], [0, 0, 1, 1], [], []>} : vector<2x32xf32>, vector<32x16xf32>, vector<2x16xf32> -> vector<2x16xf32>
    %326 = vector.broadcast %322 : vector<1x16xf32> to vector<2x16xf32>
    %327 = arith.addf %325, %326 : vector<2x16xf32>
    %cst_130 = arith.constant 5.000000e-01 : f32
    %328 = vector.broadcast %cst_130 : f32 to vector<2x16xf32>
    %329 = arith.mulf %328, %327 : vector<2x16xf32>
    %cst_131 = arith.constant 0.707106769 : f32
    %330 = vector.broadcast %cst_131 : f32 to vector<2x16xf32>
    %331 = arith.mulf %327, %330 : vector<2x16xf32>
    %332 = math.absf %331 : vector<2x16xf32>
    %cst_132 = arith.constant 0.327591091 : f32
    %333 = vector.broadcast %cst_132 : f32 to vector<2x16xf32>
    %334 = arith.mulf %333, %332 : vector<2x16xf32>
    %cst_133 = arith.constant 1.000000e+00 : f32
    %335 = vector.broadcast %cst_133 : f32 to vector<2x16xf32>
    %336 = arith.addf %335, %334 : vector<2x16xf32>
    %cst_134 = arith.constant 1.000000e+00 : f32
    %337 = vector.broadcast %cst_134 : f32 to vector<2x16xf32>
    %338 = arith.divf %337, %336 : vector<2x16xf32>
    %cst_135 = arith.constant 1.06140542 : f32
    %339 = vector.broadcast %cst_135 : f32 to vector<2x16xf32>
    %340 = arith.mulf %339, %338 : vector<2x16xf32>
    %cst_136 = arith.constant -1.45315206 : f32
    %341 = vector.broadcast %cst_136 : f32 to vector<2x16xf32>
    %342 = arith.addf %340, %341 : vector<2x16xf32>
    %343 = arith.mulf %342, %338 : vector<2x16xf32>
    %cst_137 = arith.constant 1.42141378 : f32
    %344 = vector.broadcast %cst_137 : f32 to vector<2x16xf32>
    %345 = arith.addf %343, %344 : vector<2x16xf32>
    %346 = arith.mulf %345, %338 : vector<2x16xf32>
    %cst_138 = arith.constant -0.284496725 : f32
    %347 = vector.broadcast %cst_138 : f32 to vector<2x16xf32>
    %348 = arith.addf %346, %347 : vector<2x16xf32>
    %349 = arith.mulf %348, %338 : vector<2x16xf32>
    %cst_139 = arith.constant 0.254829586 : f32
    %350 = vector.broadcast %cst_139 : f32 to vector<2x16xf32>
    %351 = arith.addf %349, %350 : vector<2x16xf32>
    %352 = arith.mulf %351, %338 : vector<2x16xf32>
    %cst_140 = arith.constant 0.000000e+00 : f32
    %353 = vector.broadcast %cst_140 : f32 to vector<2x16xf32>
    %354 = arith.subf %353, %332 : vector<2x16xf32>
    %355 = arith.mulf %354, %332 : vector<2x16xf32>
    %356 = math.exp %355 : vector<2x16xf32>
    %357 = arith.mulf %352, %356 : vector<2x16xf32>
    %cst_141 = arith.constant 1.000000e+00 : f32
    %358 = vector.broadcast %cst_141 : f32 to vector<2x16xf32>
    %359 = arith.subf %358, %357 : vector<2x16xf32>
    %cst_142 = arith.constant 0.000000e+00 : f32
    %360 = vector.broadcast %cst_142 : f32 to vector<2x16xf32>
    %361 = arith.cmpf oge, %331, %360 : vector<2x16xf32>
    %cst_143 = arith.constant 0.000000e+00 : f32
    %362 = vector.broadcast %cst_143 : f32 to vector<2x16xf32>
    %363 = arith.subf %362, %359 : vector<2x16xf32>
    %364 = arith.select %361, %359, %363 : vector<2x16xi1>, vector<2x16xf32>
    %cst_144 = arith.constant 1.000000e+00 : f32
    %365 = vector.broadcast %cst_144 : f32 to vector<2x16xf32>
    %366 = arith.addf %365, %364 : vector<2x16xf32>
    %367 = arith.mulf %329, %366 : vector<2x16xf32>
    %cst_145 = arith.constant dense<0.000000e+00> : vector<2x128xf32>
    %368 = tpu.matmul %367, %323, %cst_145 {dimension_numbers = #tpu.dot_dimension_numbers<[1], [0], [0], [1], [0, 0, 1, 1], [], []>} : vector<2x16xf32>, vector<16x128xf32>, vector<2x128xf32> -> vector<2x128xf32>
    %369 = vector.broadcast %324 : vector<1x128xf32> to vector<2x128xf32>
    %370 = arith.addf %368, %369 : vector<2x128xf32>
    %c0_146 = arith.constant 0 : index
    %c0_147 = arith.constant 0 : index
    %371 = vector.load %arg6[%c0_146, %c0_147] : memref<2x128xf32, #tpu.memory_space<vmem>>, vector<2x128xf32>
    tpu.vector_store %arg6[%c0_146, %c0_147], %370 {strides = array<i32>} : memref<2x128xf32, #tpu.memory_space<vmem>>, vector<2x128xf32>,
    return
  }
  func.func @transform_0(%arg0: i32) -> (i32, i32) {
    %c0_i32 = arith.constant 0 : i32
    %c0_i32_0 = arith.constant 0 : i32
    %c0_i32_1 = arith.constant 0 : i32
    return %c0_i32, %c0_i32_0 : i32, i32
  }
  func.func @transform_1(%arg0: i32) -> (i32, i32) {
    %c0_i32 = arith.constant 0 : i32
    %c0_i32_0 = arith.constant 0 : i32
    %c0_i32_1 = arith.constant 0 : i32
    return %c0_i32, %c0_i32_0 : i32, i32
  }
  func.func @transform_2(%arg0: i32) -> (i32, i32) {
    %c0_i32 = arith.constant 0 : i32
    %c0_i32_0 = arith.constant 0 : i32
    %c0_i32_1 = arith.constant 0 : i32
    return %c0_i32, %c0_i32_0 : i32, i32
  }
  func.func @transform_3(%arg0: i32) -> (i32, i32, i32) {
    %c0_i32 = arith.constant 0 : i32
    %c0_i32_0 = arith.constant 0 : i32
    %c0_i32_1 = arith.constant 0 : i32
    %c0_i32_2 = arith.constant 0 : i32
    return %c0_i32, %c0_i32_0, %c0_i32_1 : i32, i32, i32
  }
  func.func @transform_4(%arg0: i32) -> (i32, i32) {
    %c0_i32 = arith.constant 0 : i32
    %c0_i32_0 = arith.constant 0 : i32
    %c0_i32_1 = arith.constant 0 : i32
    return %c0_i32, %c0_i32_0 : i32, i32
  }
  func.func @transform_5(%arg0: i32) -> (i32, i32) {
    %c0_i32 = arith.constant 0 : i32
    %c0_i32_0 = arith.constant 0 : i32
    %c0_i32_1 = arith.constant 0 : i32
    return %c0_i32, %c0_i32_0 : i32, i32
  }
}

</mosaic_0001>

<bundles_post_ra>
// kernel: encoder_pallas.1
= control target key start
LH: loop header
LB: loop body
LE: loop exit
PB: predicated region body
PF: predicated region fallthrough
CT: control target
= control target key end

     0   :  { %10 = vsyncpa [#allocation3], 0  ;;  %s4314_s0 = inlined_call_operand.vmem [shape: f32[16,32], index: 0, kind: input, shape index: {}]   ;;  %s4315_s1 = inlined_call_operand.vmem [shape: f32[16,16], index: 1, kind: input, shape index: {}]   ;;  %s4316_s2 = inlined_call_operand.vmem [shape: f32[16,32], index: 2, kind: input, shape index: {}]   ;;  %s4317_s3 = inlined_call_operand.hbm [shape: f32[2,232,128], index: 3, kind: input, shape index: {}]   ;;  %s4318_s4 = inlined_call_operand.vmem [shape: f32[56,128], index: 4, kind: input, shape index: {}]   ;;  %s4319_s5 = inlined_call_operand.hbm [shape: f32[2,128], index: 5, kind: output, shape index: {}]  }
   0x1   :  { %11 = vsyncpa [#allocation4], 0  ;;  %s3843_s18 = smov [#allocation2]   ;;  %s3795_s22 = scalar_lea.hbm %s4317_s3, 7424 }
   0x2   :  { %s23_s19 = sshll.u32 %s3843_s18, 4  ;;  %p3796_p0 = scmp.ne.s32.totalorder %s4317_s3, %s3795_s22  ;;  %s24_s19 = int_to_ptr.vmem [resolvable:$true] %s23_s19 }
   0x3   :  { %p3799_p1 = scmp.lt.u32.totalorder %s3795_s22, %s4317_s3 }
   0x5   :  { %p3801_p2 = pnand %p3799_p1, %p3796_p0 }
   0x7   :  { %3804 = shalt.err (!%p3801_p2)
}
   0x8   :  { %s3805_s27 = scalar_lea.vmem %s24_s19, 7424  ;;  %p3810_p4 = scmp.lt.s32.totalorder %s24_s19, %s24_s19 }
   0x9   :  { %p3806_p3 = scmp.ne.s32.totalorder %s24_s19, %s3805_s27  ;;  %p3811_p5 = scmp.lt.s32.totalorder %s3805_s27, %s3805_s27 }
   0xb   :  { %p3812_p6 = por %p3811_p5, %p3810_p4 }
   0xd   :  { %p3813_p7 = pnand %p3812_p6, %p3806_p3 }
   0xf   :  { %3816 = shalt.err (!%p3813_p7)
}
  0x10   :  { %s3844_s28 = smov 128   ;;  %s3845_s29 = smov 8  }
  0x11   :  { %29 = dma.hbm_to_vmem [thread:$0]  %s4317_s3, 7424, %s24_s19, [#allocation3], %s3844_s28, %s3844_s28, %s3845_s29  }
  0x12   :  { %3839 = dma.done.wait [#allocation3], 7424  }
  0x13   :  { %3840 = vsyncadd [#allocation3], 4294959872  ;;  %v37_v0 = vld [vmem:[%s4316_s2] sm:$0xff]  ;;  %s3846_s9 = smov 16   ;;  %s3847_s10 = smov 112   ;;  %v38_v1 = vld [vmem:[%s4316_s2 + $0x8] sm:$0xff] }
  0x14   :  { %49 = vrot.lane.b32.xlu0 %v37_v0, %s3846_s9  ;;  %41 = vrot.lane.b32.xlu1 %v37_v0, %s3847_s10  ;;  %v35_v2 = vld [vmem:[%s4314_s0] sm:$0xff]  ;;  %v36_v4 = vld [vmem:[%s4314_s0 + $0x8] sm:$0xff]  ;;  %vm79_vm0 = vcmask 130048   ;;  %vm87_vm1 = vcmask 261120   ;;  %v111_v30 = vld [vmem:[#allocation2 + $0x10] sm:$0xff]  ;;  %vm205_vm2 = vcmask 64512  }
  0x15   :  { %v67_v3 = vmul.f32 %v37_v0, %v35_v2  ;;  %v68_v5 = vmul.f32 %v38_v1, %v36_v4  ;;  %v109_v28 = vld [vmem:[#allocation2] sm:$0xff]  ;;  %v110_v29 = vld [vmem:[#allocation2 + $0x8] sm:$0xff]  ;;  %v112_v32 = vld [vmem:[#allocation2 + $0x18] sm:$0xff]  ;;  %s3848_s0 = smov 88   ;;  %s3849_s2 = smov 96   ;;  %vm1026_vm4 = vcmask 195584  }
  0x16   :  { %v3393_v31 = vpack.c.bf16 %v110_v29, %v109_v28  ;;  %v3397_v33 = vpack.c.bf16 %v112_v32, %v111_v30  ;;  %v2904_v41 = vld [vmem:[#allocation2 + $0xe4] ss:$0 sm:$0xff]  ;;  %v2905_v47 = vld [vmem:[#allocation2 + $0xe0] ss:$0 sm:$0xff]  ;;  %s3850_s16 = smov 120   ;;  %vm3963_vm3 = vmpackc.low %vm205_vm2, %vm205_vm2  ;;  %s3851_s21 = smov 64  }
  0x17   :  { %v3982_v0 = vld [vmem:[%s4315_s1 + $0x8] sm:$0xff]  ;;  %s3852_s22 = smov 80   ;;  %s3853_s23 = smov 56   ;;  %vm2627_vm5 = vcmask 7168   ;;  %vm3861_vm6 = vmmov 0   ;;  %vm2697_vm7 = vcmask 1040384  }
  0x18   :  { %51 = vrot.lane.b32.xlu0 %v38_v1, %s3846_s9  ;;  %43 = vrot.lane.b32.xlu1 %v38_v1, %s3847_s10  ;;  %v3987_v1 = vld [vmem:[%s4315_s1] sm:$0xff]  ;;  %s3854_s24 = smov 72   ;;  %s3855_s25 = smov 104  }
  0x19   :  { %3394 = vmatprep.subr.bf16.mxu1 %v3393_v31  ;;  %s3856_s26 = smov 48   ;;  %s3857_s27 = smov 40  }
  0x1a   :  { %3396 = vmatpush3.bf16.msra.mxu1 %v3393_v31  ;;  %s3858_s28 = smov 24  }
  0x1b   :  { %3398 = vmatprep.subr.bf16.mxu1 %v3397_v33 }
  0x1c   :  { %71 = vrot.lane.b32.xlu1 %v67_v3, %s3846_s9 }
  0x1e   :  { %3400 = vmatpush3.bf16.msra.mxu1 %v3397_v33 }
  0x20   :  { %73 = vrot.lane.b32.xlu1 %v68_v5, %s3846_s9 }
  0x86   :  { %v50_v6 = vpop.permute.xlu0 %49  ;;  %v42_v10 = vpop.permute.xlu1 %41 }
  0x87   :  { %v55_v7 = vmul.f32 %v50_v6, %v35_v2  ;;  %v47_v13 = vmul.f32 %v42_v10, %v35_v2 }
  0x89   :  { %59 = vrot.lane.b32.xlu0 %v55_v7, %s3847_s10 }
  0x8a   :  { %v52_v8 = vpop.permute.xlu0 %51  ;;  %v44_v11 = vpop.permute.xlu1 %43 }
  0x8b   :  { %v56_v9 = vmul.f32 %v52_v8, %v36_v4  ;;  %v48_v18 = vmul.f32 %v44_v11, %v36_v4 }
  0x8d   :  { %61 = vrot.lane.b32.xlu0 %v56_v9, %s3847_s10 }
  0x8e   :  { %v72_v12 = vpop.permute.xlu1 %71 }
  0x8f   :  { %v77_v14 = vadd.f32 %v72_v12, %v67_v3 }
  0x92   :  { %v74_v16 = vpop.permute.xlu1 %73 }
  0x93   :  { %v78_v19 = vadd.f32 %v74_v16, %v68_v5 }
  0xfb   :  { %v60_v15 = vpop.permute.xlu0 %59 }
  0xfc   :  { %v65_v17 = vsub.f32 %v47_v13, %v60_v15 }
  0xfe   :  { %v3928_v20 = vsel %vm79_vm0, %v65_v17, %v77_v14 }
  0xff   :  { %v62_v21 = vpop.permute.xlu0 %61  ;;  %v85_v22 = vmul.f32 %v3928_v20, %v3928_v20 }
 0x100   :  { %v66_v23 = vsub.f32 %v48_v18, %v62_v21 }
 0x101   :  { %v88_v24 = vsel %vm87_vm1, %v85_v22, 0.0 }
 0x102   :  { %89 = vadd.xlane.f32.xlu0 %v88_v24  ;;  %v3934_v25 = vsel %vm79_vm0, %v66_v23, %v78_v19 }
 0x103   :  { %v86_v26 = vmul.f32 %v3934_v25, %v3934_v25 }
 0x105   :  { %v91_v27 = vsel %vm87_vm1, %v86_v26, 0.0 }
 0x106   :  { %92 = vadd.xlane.f32.xlu1 %v91_v27 }
 0x18f   :  { %v90_v34 = vpop.xlane.xlu0 %89 }
 0x190   :  { %v95_v35 = vmul.f32 0.03125, %v90_v34 }
 0x192   :  { %v97_v36 = vadd.f32 1e-06, %v95_v35 }
 0x193   :  { %v93_v37 = vpop.xlane.xlu1 %92 }
 0x194   :  { %3697 = vrsqrt.f32 %v97_v36  ;;  %v96_v38 = vmul.f32 0.03125, %v93_v37 }
 0x196   :  { %v98_v39 = vadd.f32 1e-06, %v96_v38 }
 0x198   :  { %3699 = vrsqrt.f32 %v98_v39 }
 0x19e   :  { %v3698_v40 = vpop.eup %3697 }
 0x19f   :  { %v101_v42 = vmul.f32 %v3698_v40, %v3928_v20 }
 0x1a1   :  { %v107_v43 = vmul.f32 %v2904_v41, %v101_v42 }
 0x1a2   :  { %v3700_v44 = vpop.eup %3699 }
 0x1a3   :  { %v102_v45 = vmul.f32 %v3700_v44, %v3934_v25  ;;  %3135 = vmatprep.mubr.msk.f32.mxu1 %vm87_vm1, %v107_v43 }
 0x1a5   :  { %v108_v46 = vmul.f32 %v2904_v41, %v102_v45 }
 0x1a7   :  { %3136 = vmatmul.mubr.msk.f32.vlgmr.msra.gmra.mrb[0].mxu1 %vm87_vm1, %v108_v46 }
 0x27a   :  { %v3137_v48 = vpop.f32.mrb[0].mxu1 }
 0x27b   :  { %v3943_v49 = vadd.f32 %v3137_v48, %v2905_v47  ;;  %v190_v50 = vpop.f32.mrb[1].mxu1 }
 0x27c   :  { %v3945_v51 = vadd.f32 %v2905_v47, %v190_v50 }
 0x27e   :  { %3142 = vmatprep.mubr.msk.f32.mxu1 %vm205_vm2, %v3945_v51  ;;  %v3951_v52 = vpack.i.bf16 %v3943_v49, %v3945_v51 }
 0x280   :  { %3621 = vrot.lane.b32.xlu1 %v3951_v52, %s3848_s0  ;;  %3616 = vrot.lane.b32.xlu0 %v3951_v52, %s3849_s2 }
 0x284   :  { %400 = vrot.lane.b32.xlu1 %v3943_v49, %s3850_s16  ;;  %398 = vrot.lane.b32.xlu0 %v3945_v51, %s3850_s16 }
 0x2f2   :  { %v3622_v53 = vpop.permute.xlu1 %3621  ;;  %v3617_v54 = vpop.permute.xlu0 %3616 }
 0x2f3   :  { %v3624_v55 = vunpack.i.h.bf16 %v3622_v53  ;;  %v3623_v56 = vunpack.i.l.bf16 %v3622_v53  ;;  %v3619_v57 = vunpack.i.h.bf16 %v3617_v54  ;;  %v3618_v58 = vunpack.i.l.bf16 %v3617_v54 }
 0x2f5   :  { %v3401_v60 = vpack.c.bf16 %v3619_v57, %v3618_v58  ;;  %v3411_v61 = vpack.c.bf16 %v3624_v55, %v3623_v56 }
 0x2f6   :  { %v399_v62 = vpop.permute.xlu0 %398  ;;  %v401_v63 = vpop.permute.xlu1 %400 }
 0x2f7   :  { %3403 = vmatprep.subr.msk.bf16.mxu1 %vm3963_vm3, %v3401_v60 }
 0x2f8   :  { %3406 = vmatpush3.bf16.xpose.msk.msra.mxu1 %vm3963_vm3, %v3401_v60 }
 0x2f9   :  { %3413 = vmatprep.subr.msk.bf16.mxu1 %vm3963_vm3, %v3411_v61 }
 0x2ff   :  { %3143 = vmatmul.mubr.msk.f32.vlgmr.msra.gmra.mrb[2].mxu1 %vm205_vm2, %v3943_v49 }
 0x300   :  { %3416 = vmatpush3.bf16.xpose.msk.msra.mxu1 %vm3963_vm3, %v3411_v61  ;;  %3156 = vmatprep.mubr.msk.f32.mxu1 %vm205_vm2, %v399_v62 }
 0x307   :  { %3157 = vmatmul.mubr.msk.f32.vlgmr.msra.gmra.mrb[4].mxu1 %vm205_vm2, %v401_v63 }
 0x3d2   :  { %v3144_v2 = vpop.f32.mrb[2].mxu1 }
 0x3d3   :  { %v286_v3 = vadd.f32 %v3144_v2, %v3982_v0  ;;  %v280_v4 = vpop.f32.mrb[3].mxu1 }
 0x3d4   :  { %v281_v5 = vadd.f32 %v280_v4, %v3987_v1 }
 0x3d5   :  { %v292_v6 = vsel %vm79_vm0, %v286_v3, -inf }
 0x3d6   :  { %293 = vmax.xlane.f32.xlu1 %v292_v6  ;;  %v289_v7 = vsel %vm79_vm0, %v281_v5, -inf }
 0x3d7   :  { %290 = vmax.xlane.f32.xlu0 %v289_v7 }
 0x3da   :  { %v3158_v8 = vpop.f32.mrb[4].mxu1 }
 0x3db   :  { %v480_v9 = vpop.f32.mrb[5].mxu1  ;;  %v486_v11 = vadd.f32 %v3158_v8, %v3982_v0 }
 0x3dc   :  { %v481_v10 = vadd.f32 %v480_v9, %v3987_v1 }
 0x3dd   :  { %v492_v13 = vsel %vm79_vm0, %v486_v11, -inf }
 0x3de   :  { %v489_v12 = vsel %vm79_vm0, %v481_v10, -inf }
 0x3df   :  { %490 = vmax.xlane.f32.xlu0 %v489_v12 }
 0x3e3   :  { %493 = vmax.xlane.f32.xlu0 %v492_v13 }
 0x3e7   :  { %3626 = vrot.lane.b32.xlu1 %v3951_v52, %s3851_s21 }
 0x463   :  { %v294_v14 = vpop.xlane.xlu1 %293 }
 0x464   :  { %v296_v15 = vsub.f32 %v286_v3, %v294_v14  ;;  %v291_v16 = vpop.xlane.xlu0 %290 }
 0x465   :  { %v295_v17 = vsub.f32 %v281_v5, %v291_v16 }
 0x466   :  { %v299_v18 = vmul.f32 1.442695, %v296_v15 }
 0x467   :  { %v297_v19 = vmul.f32 1.442695, %v295_v17  ;;  %v3627_v21 = vpop.permute.xlu1 %3626 }
 0x468   :  { %3701 = vpow2.f32 %v299_v18  ;;  %v3629_v22 = vunpack.i.h.bf16 %v3627_v21  ;;  %v3628_v23 = vunpack.i.l.bf16 %v3627_v21 }
 0x469   :  { %3703 = vpow2.f32 %v297_v19 }
 0x46a   :  { %v3407_v24 = vpack.c.bf16 %v3629_v22, %v3628_v23 }
 0x46c   :  { %3408 = vmatprep.subr.bf16.mxu0 %v3407_v24  ;;  %v491_v26 = vpop.xlane.xlu0 %490 }
 0x46d   :  { %3410 = vmatpush3.bf16.msra.mxu0 %v3407_v24  ;;  %v495_v36 = vsub.f32 %v481_v10, %v491_v26 }
 0x46f   :  { %v497_v37 = vmul.f32 1.442695, %v495_v36 }
 0x470   :  { %v494_v27 = vpop.xlane.xlu0 %493 }
 0x471   :  { %v496_v28 = vsub.f32 %v486_v11, %v494_v27 }
 0x472   :  { %v3702_v29 = vpop.eup %3701 }
 0x473   :  { %v3704_v30 = vpop.eup %3703  ;;  %v499_v31 = vmul.f32 1.442695, %v496_v28  ;;  %v304_v32 = vsel %vm79_vm0, %v3702_v29, 0.0 }
 0x474   :  { %305 = vadd.xlane.f32.xlu0 %v304_v32  ;;  %v301_v33 = vsel %vm79_vm0, %v3704_v30, 0.0 }
 0x475   :  { %3705 = vpow2.f32 %v499_v31  ;;  %302 = vadd.xlane.f32.xlu1 %v301_v33 }
 0x476   :  { %3707 = vpow2.f32 %v497_v37 }
 0x47f   :  { %v3706_v34 = vpop.eup %3705 }
 0x480   :  { %v504_v35 = vsel %vm79_vm0, %v3706_v34, 0.0  ;;  %v3708_v38 = vpop.eup %3707 }
 0x481   :  { %505 = vadd.xlane.f32.xlu0 %v504_v35  ;;  %v501_v39 = vsel %vm79_vm0, %v3708_v38, 0.0 }
 0x486   :  { %3636 = vrot.lane.b32.xlu1 %v3951_v52, %s3852_s22 }
 0x497   :  { %3631 = vrot.lane.b32.xlu0 %v3951_v52, %s3853_s23 }
 0x49b   :  { %600 = vrot.lane.b32.xlu0 %v3943_v49, %s3847_s10 }
 0x4aa   :  { %502 = vadd.xlane.f32.xlu1 %v501_v39 }
 0x4bb   :  { %598 = vrot.lane.b32.xlu1 %v3945_v51, %s3847_s10 }
 0x501   :  { %v306_v40 = vpop.xlane.xlu0 %305 }
 0x502   :  { %3709 = vrcp.f32 %v306_v40  ;;  %v303_v41 = vpop.xlane.xlu1 %302 }
 0x503   :  { %3711 = vrcp.f32 %v303_v41 }
 0x506   :  { %v3637_v47 = vpop.permute.xlu1 %3636 }
 0x507   :  { %v3639_v50 = vunpack.i.h.bf16 %v3637_v47  ;;  %v3638_v53 = vunpack.i.l.bf16 %v3637_v47 }
 0x509   :  { %v3421_v57 = vpack.c.bf16 %v3639_v50, %v3638_v53 }
 0x50c   :  { %v3710_v42 = vpop.eup %3709 }
 0x50d   :  { %v3712_v43 = vpop.eup %3711  ;;  %v310_v46 = vmul.f32 %v3710_v42, %v3702_v29 }
 0x50e   :  { %v506_v44 = vpop.xlane.xlu0 %505  ;;  %v309_v45 = vmul.f32 %v3712_v43, %v3704_v30 }
 0x50f   :  { %3713 = vrcp.f32 %v506_v44 }
 0x510   :  { %3149 = vmatprep.mubr.msk.f32.mxu0 %vm79_vm0, %v309_v45 }
 0x511   :  { %3150 = vmatmul.mubr.msk.f32.vlgmr.msra.gmra.mrb[0].mxu0 %vm79_vm0, %v310_v46 }
 0x512   :  { %v3632_v48 = vpop.permute.xlu0 %3631 }
 0x513   :  { %v3634_v54 = vunpack.i.h.bf16 %v3632_v48  ;;  %v3633_v55 = vunpack.i.l.bf16 %v3632_v48 }
 0x515   :  { %v3417_v56 = vpack.c.bf16 %v3634_v54, %v3633_v55 }
 0x516   :  { %v601_v3 = vpop.permute.xlu0 %600 }
 0x517   :  { %3418 = vmatprep.subr.bf16.mxu0 %v3417_v56 }
 0x518   :  { %3420 = vmatpush3.bf16.msra.mxu0 %v3417_v56 }
 0x519   :  { %3423 = vmatprep.subr.msk.bf16.mxu0 %vm3963_vm3, %v3421_v57  ;;  %v3714_v60 = vpop.eup %3713 }
 0x51a   :  { %v510_v63 = vmul.f32 %v3714_v60, %v3706_v34 }
 0x537   :  { %v503_v58 = vpop.xlane.xlu1 %502 }
 0x538   :  { %3715 = vrcp.f32 %v503_v58 }
 0x53b   :  { %v599_v2 = vpop.permute.xlu1 %598 }
 0x542   :  { %v3716_v61 = vpop.eup %3715 }
 0x543   :  { %v509_v62 = vmul.f32 %v3716_v61, %v3708_v38 }
 0x545   :  { %3163 = vmatprep.mubr.msk.f32.mxu0 %vm79_vm0, %v509_v62 }
 0x546   :  { %3164 = vmatmul.mubr.msk.f32.vlgmr.msra.gmra.mrb[2].mxu0 %vm79_vm0, %v510_v63 }
 0x547   :  { %3426 = vmatpush3.bf16.xpose.msk.msra.mxu0 %vm3963_vm3, %v3421_v57  ;;  %3170 = vmatprep.mubr.msk.f32.mxu0 %vm205_vm2, %v599_v2 }
 0x54e   :  { %3171 = vmatmul.mubr.msk.f32.vlgmr.msra.gmra.mrb[4].mxu0 %vm205_vm2, %v601_v3 }
 0x5e4   :  { %v4021_v4 = vpop.f32.mrb[0].mxu0 }
 0x5e5   :  { %v4023_v5 = vpop.f32.mrb[1].mxu0 }
 0x619   :  { %v4025_v6 = vpop.f32.mrb[2].mxu0 }
 0x61a   :  { %v4027_v7 = vpop.f32.mrb[3].mxu0 }
 0x621   :  { %v3172_v8 = vpop.f32.mrb[4].mxu0 }
 0x622   :  { %v686_v9 = vadd.f32 %v3172_v8, %v3982_v0  ;;  %v680_v10 = vpop.f32.mrb[5].mxu0 }
 0x623   :  { %v681_v11 = vadd.f32 %v680_v10, %v3987_v1 }
 0x624   :  { %v692_v12 = vsel %vm79_vm0, %v686_v9, -inf }
 0x625   :  { %693 = vmax.xlane.f32.xlu0 %v692_v12  ;;  %v689_v13 = vsel %vm79_vm0, %v681_v11, -inf  ;;  %v1030_v12 = vld [vmem:[#allocation2 + $0x28] sm:$0xff] }
 0x626   :  { %690 = vmax.xlane.f32.xlu1 %v689_v13  ;;  %v1031_v13 = vld [vmem:[#allocation2 + $0x30] sm:$0xff] }
 0x6b2   :  { %v694_v14 = vpop.xlane.xlu0 %693 }
 0x6b3   :  { %v696_v15 = vsub.f32 %v686_v9, %v694_v14  ;;  %v691_v16 = vpop.xlane.xlu1 %690 }
 0x6b4   :  { %v695_v17 = vsub.f32 %v681_v11, %v691_v16 }
 0x6b5   :  { %v699_v18 = vmul.f32 1.442695, %v696_v15  ;;  %v1032_v15 = vld [vmem:[#allocation2 + $0x38] sm:$0xff] }
 0x6b6   :  { %v697_v19 = vmul.f32 1.442695, %v695_v17  ;;  %v3445_v16 = vpack.c.bf16 %v1032_v15, %v1031_v13 }
 0x6b7   :  { %3717 = vpow2.f32 %v699_v18 }
 0x6b8   :  { %3719 = vpow2.f32 %v697_v19 }
 0x6c1   :  { %v3718_v21 = vpop.eup %3717 }
 0x6c2   :  { %v3720_v22 = vpop.eup %3719  ;;  %v704_v23 = vsel %vm79_vm0, %v3718_v21, 0.0 }
 0x6c3   :  { %705 = vadd.xlane.f32.xlu1 %v704_v23  ;;  %v701_v24 = vsel %vm79_vm0, %v3720_v22, 0.0 }
 0x6c4   :  { %702 = vadd.xlane.f32.xlu0 %v701_v24 }
 0x6d4   :  { %3646 = vrot.lane.b32.xlu1 %v3951_v52, %s3854_s24 }
 0x6d8   :  { %798 = vrot.lane.b32.xlu1 %v3945_v51, %s3855_s25 }
 0x6da   :  { %3641 = vrot.lane.b32.xlu0 %v3951_v52, %s3856_s26 }
 0x6de   :  { %800 = vrot.lane.b32.xlu0 %v3943_v49, %s3855_s25 }
 0x750   :  { %v706_v26 = vpop.xlane.xlu1 %705 }
 0x751   :  { %3721 = vrcp.f32 %v706_v26  ;;  %v703_v27 = vpop.xlane.xlu0 %702 }
 0x752   :  { %3723 = vrcp.f32 %v703_v27 }
 0x754   :  { %v3647_v28 = vpop.permute.xlu1 %3646 }
 0x755   :  { %v3642_v29 = vpop.permute.xlu0 %3641  ;;  %v3649_v30 = vunpack.i.h.bf16 %v3647_v28  ;;  %v3648_v31 = vunpack.i.l.bf16 %v3647_v28 }
 0x756   :  { %v3644_v32 = vunpack.i.h.bf16 %v3642_v29  ;;  %v3643_v33 = vunpack.i.l.bf16 %v3642_v29 }
 0x757   :  { %v3431_v35 = vpack.c.bf16 %v3649_v30, %v3648_v31 }
 0x758   :  { %v3427_v34 = vpack.c.bf16 %v3644_v32, %v3643_v33  ;;  %v799_v38 = vpop.permute.xlu1 %798  ;;  %v2934_v33 = vld [vmem:[#allocation2 + $0xe1] ss:$0 sm:$0xff] }
 0x759   :  { %v801_v39 = vpop.permute.xlu0 %800 }
 0x75a   :  { %3428 = vmatprep.subr.bf16.mxu1 %v3427_v34 }
 0x75b   :  { %v3722_v51 = vpop.eup %3721  ;;  %3430 = vmatpush3.bf16.msra.mxu1 %v3427_v34 }
 0x75c   :  { %v3724_v36 = vpop.eup %3723  ;;  %3433 = vmatprep.subr.msk.bf16.mxu1 %vm3963_vm3, %v3431_v35  ;;  %v710_v37 = vmul.f32 %v3722_v51, %v3718_v21 }
 0x75d   :  { %v709_v49 = vmul.f32 %v3724_v36, %v3720_v22 }
 0x75f   :  { %3177 = vmatprep.mubr.msk.f32.mxu1 %vm79_vm0, %v709_v49 }
 0x760   :  { %3178 = vmatmul.mubr.msk.f32.vlgmr.msra.gmra.mrb[6].mxu1 %vm79_vm0, %v710_v37 }
 0x761   :  { %3184 = vmatprep.mubr.msk.f32.mxu1 %vm205_vm2, %v799_v38 }
 0x764   :  { %3436 = vmatpush3.bf16.xpose.msk.msra.mxu1 %vm3963_vm3, %v3431_v35 }
 0x76b   :  { %3185 = vmatmul.mubr.msk.f32.vlgmr.msra.gmra.mrb[8].mxu1 %vm205_vm2, %v801_v39 }
 0x833   :  { %v3179_v40 = vpop.f32.mrb[6].mxu1 }
 0x834   :  { %v789_v41 = vpop.f32.mrb[7].mxu1 }
 0x83e   :  { %v3186_v42 = vpop.f32.mrb[8].mxu1 }
 0x83f   :  { %v886_v43 = vadd.f32 %v3186_v42, %v3982_v0  ;;  %v880_v44 = vpop.f32.mrb[9].mxu1  ;;  %v1149_v42 = vld [vmem:[#allocation2 + $0x58] sm:$0xff] }
 0x840   :  { %v881_v45 = vadd.f32 %v880_v44, %v3987_v1  ;;  %v1151_v44 = vld [vmem:[#allocation2 + $0x60] sm:$0xff] }
 0x841   :  { %v892_v46 = vsel %vm79_vm0, %v886_v43, -inf }
 0x842   :  { %893 = vmax.xlane.f32.xlu0 %v892_v46  ;;  %v889_v47 = vsel %vm79_vm0, %v881_v45, -inf  ;;  %v1153_v46 = vld [vmem:[#allocation2 + $0x70] sm:$0xff] }
 0x843   :  { %890 = vmax.xlane.f32.xlu1 %v889_v47 }
 0x8cf   :  { %v894_v48 = vpop.xlane.xlu0 %893 }
 0x8d0   :  { %v896_v50 = vsub.f32 %v886_v43, %v894_v48  ;;  %v891_v53 = vpop.xlane.xlu1 %890  ;;  %v1154_v48 = vld [vmem:[#allocation2 + $0x78] sm:$0xff] }
 0x8d1   :  { %v895_v54 = vsub.f32 %v881_v45, %v891_v53  ;;  %v1152_v45 = vld [vmem:[#allocation2 + $0x68] sm:$0xff]  ;;  %v1155_v53 = vld [vmem:[#allocation2 + $0x80] sm:$0xff] }
 0x8d2   :  { %v899_v55 = vmul.f32 1.442695, %v896_v50  ;;  %v3457_v47 = vpack.c.bf16 %v1152_v45, %v1151_v44  ;;  %v3461_v50 = vpack.c.bf16 %v1154_v48, %v1153_v46 }
 0x8d3   :  { %v897_v56 = vmul.f32 1.442695, %v895_v54  ;;  %v1156_v54 = vld [vmem:[#allocation2 + $0x88] sm:$0xff] }
 0x8d4   :  { %3725 = vpow2.f32 %v899_v55  ;;  %v3465_v55 = vpack.c.bf16 %v1156_v54, %v1155_v53  ;;  %v2940_v54 = vld [vmem:[#allocation2 + $0x1cc] ss:$0 sm:$0xff] }
 0x8d5   :  { %3727 = vpow2.f32 %v897_v56  ;;  %v1157_v56 = vld [vmem:[#allocation2 + $0x90] sm:$0xff] }
 0x8de   :  { %v3726_v57 = vpop.eup %3725 }
 0x8df   :  { %v3728_v58 = vpop.eup %3727  ;;  %v904_v60 = vsel %vm79_vm0, %v3726_v57, 0.0 }
 0x8e0   :  { %905 = vadd.xlane.f32.xlu1 %v904_v60  ;;  %v901_v61 = vsel %vm79_vm0, %v3728_v58, 0.0  ;;  %v1159_v60 = vld [vmem:[#allocation2 + $0xa0] sm:$0xff] }
 0x8e1   :  { %902 = vadd.xlane.f32.xlu0 %v901_v61  ;;  %v1160_v61 = vld [vmem:[#allocation2 + $0xa8] sm:$0xff] }
 0x8f1   :  { %1000 = vrot.lane.b32.xlu1 %v4027_v7, %s3845_s29 }
 0x8f5   :  { %1002 = vrot.lane.b32.xlu1 %v4025_v6, %s3845_s29 }
 0x8f7   :  { %3651 = vrot.lane.b32.xlu0 %v3951_v52, %s3857_s27  ;;  %v1029_v52 = vld [vmem:[#allocation2 + $0x20] sm:$0xff] }
 0x8f8   :  { %v3441_v14 = vpack.c.bf16 %v1030_v12, %v1029_v52 }
 0x8f9   :  { %1010 = vrot.lane.b32.xlu1 %v3179_v40, %s3846_s9  ;;  %v1147_v40 = vld [vmem:[#allocation2 + $0x48] sm:$0xff] }
 0x8fb   :  { %1008 = vrot.lane.b32.xlu0 %v789_v41, %s3846_s9  ;;  %v1148_v41 = vld [vmem:[#allocation2 + $0x50] sm:$0xff] }
 0x8fc   :  { %v3453_v43 = vpack.c.bf16 %v1149_v42, %v1148_v41  ;;  %v1363_v41 = vld [vmem:[#allocation2 + $0xf0] sm:$0xff]  ;;  %v1365_v42 = vld [vmem:[#allocation2 + $0x100] sm:$0xff] }
 0x96d   :  { %v906_v62 = vpop.xlane.xlu1 %905 }
 0x96e   :  { %3729 = vrcp.f32 %v906_v62  ;;  %v903_v63 = vpop.xlane.xlu0 %902  ;;  %v3473_v62 = vpack.c.bf16 %v1160_v61, %v1159_v60  ;;  %v2941_v61 = vld [vmem:[#allocation2 + $0x1c8] ss:$0 sm:$0xff] }
 0x96f   :  { %3731 = vrcp.f32 %v903_v63  ;;  %v1161_v63 = vld [vmem:[#allocation2 + $0xb0] sm:$0xff] }
 0x971   :  { %v1001_v19 = vpop.permute.xlu1 %1000 }
 0x972   :  { %v3652_v2 = vpop.permute.xlu0 %3651  ;;  %v1022_v24 = vsel %vm205_vm2, %v4023_v5, %v1001_v19 }
 0x973   :  { %v3654_v3 = vunpack.i.h.bf16 %v3652_v2  ;;  %v3653_v8 = vunpack.i.l.bf16 %v3652_v2  ;;  %v1162_v2 = vld [vmem:[#allocation2 + $0xb8] sm:$0xff] }
 0x975   :  { %v3437_v9 = vpack.c.bf16 %v3654_v3, %v3653_v8  ;;  %v1003_v21 = vpop.permute.xlu1 %1002  ;;  %v3477_v3 = vpack.c.bf16 %v1162_v2, %v1161_v63  ;;  %v1163_v8 = vld [vmem:[#allocation2 + $0xc0] sm:$0xff] }
 0x976   :  { %v1009_v23 = vpop.permute.xlu0 %1008  ;;  %v1023_v27 = vsel %vm205_vm2, %v4021_v4, %v1003_v21 }
 0x977   :  { %3438 = vmatprep.subr.bf16.mxu0 %v3437_v9  ;;  %v1024_v28 = vsel %vm79_vm0, %v1022_v24, %v1009_v23  ;;  %v1166_v23 = vld [vmem:[#allocation2 + $0xd8] sm:$0xff] }
 0x978   :  { %v3730_v7 = vpop.eup %3729  ;;  %3440 = vmatpush3.bf16.msra.mxu0 %v3437_v9  ;;  %v1164_v9 = vld [vmem:[#allocation2 + $0xc8] sm:$0xff] }
 0x979   :  { %v3732_v6 = vpop.eup %3731  ;;  %v910_v11 = vmul.f32 %v3730_v7, %v3726_v57  ;;  %3442 = vmatprep.subr.bf16.mxu0 %v3441_v14  ;;  %v1011_v22 = vpop.permute.xlu1 %1010  ;;  %v1158_v57 = vld [vmem:[#allocation2 + $0x98] sm:$0xff]  ;;  %v3481_v7 = vpack.c.bf16 %v1164_v9, %v1163_v8 }
 0x97a   :  { %v909_v10 = vmul.f32 %v3732_v6, %v3728_v58  ;;  %v1025_v30 = vsel %vm79_vm0, %v1023_v27, %v1011_v22  ;;  %v3469_v58 = vpack.c.bf16 %v1158_v57, %v1157_v56  ;;  %v1165_v22 = vld [vmem:[#allocation2 + $0xd0] sm:$0xff] }
 0x97b   :  { %v3485_v24 = vpack.c.bf16 %v1166_v23, %v1165_v22 }
 0x97c   :  { %3191 = vmatprep.mubr.msk.f32.mxu0 %vm79_vm0, %v909_v10 }
 0x97d   :  { %3192 = vmatmul.mubr.msk.f32.vlgmr.msra.gmra.mrb[6].mxu0 %vm79_vm0, %v910_v11 }
 0x97e   :  { %3444 = vmatpush3.bf16.msra.mxu0 %v3441_v14 }
 0x97f   :  { %3446 = vmatprep.subr.bf16.mxu0 %v3445_v16 }
 0x982   :  { %3448 = vmatpush3.bf16.msra.mxu0 %v3445_v16  ;;  %v2935_v16 = vld [vmem:[#allocation2 + $0xe5] ss:$0 sm:$0xff] }
 0x983   :  { %3458 = vmatprep.subr.bf16.mxu0 %v3457_v47 }
 0xa50   :  { %v3193_v17 = vpop.f32.mrb[6].mxu0 }
 0xa51   :  { %1018 = vrot.lane.b32.xlu1 %v3193_v17, %s3858_s28  ;;  %v989_v18 = vpop.f32.mrb[7].mxu0 }
 0xa52   :  { %1016 = vrot.lane.b32.xlu0 %v989_v18, %s3858_s28 }
 0xac3   :  { %v1019_v26 = vpop.permute.xlu1 %1018 }
 0xac4   :  { %v1017_v29 = vpop.permute.xlu0 %1016  ;;  %v1028_v32 = vsel %vm1026_vm4, %v1025_v30, %v1019_v26  ;;  %v2936_v26 = vld [vmem:[#allocation2 + $0xe2] ss:$0 sm:$0xff] }
 0xac5   :  { %v1027_v31 = vsel %vm1026_vm4, %v1024_v28, %v1017_v29 }
 0xac6   :  { %3202 = vmatprep.mubr.msk.f32.mxu0 %vm87_vm1, %v1027_v31 }
 0xac7   :  { %3203 = vmatmul.mubr.msk.f32.vlgmr.msra.gmra.mrb[8].mxu0 %vm87_vm1, %v1028_v32 }
 0xac8   :  { %3460 = vmatpush3.bf16.msra.mxu0 %v3457_v47 }
 0xac9   :  { %3462 = vmatprep.subr.bf16.mxu0 %v3461_v50 }
 0xacc   :  { %3464 = vmatpush3.bf16.msra.mxu0 %v3461_v50 }
 0xacd   :  { %3466 = vmatprep.subr.bf16.mxu0 %v3465_v55 }
 0xad0   :  { %3468 = vmatpush3.bf16.msra.mxu0 %v3465_v55 }
 0xad1   :  { %3470 = vmatprep.subr.bf16.mxu0 %v3469_v58 }
 0xad4   :  { %3472 = vmatpush3.bf16.msra.mxu0 %v3469_v58 }
 0xad5   :  { %3474 = vmatprep.subr.bf16.mxu0 %v3473_v62 }
 0xad8   :  { %3476 = vmatpush3.bf16.msra.mxu0 %v3473_v62 }
 0xad9   :  { %3478 = vmatprep.subr.bf16.mxu0 %v3477_v3 }
 0xadc   :  { %3480 = vmatpush3.bf16.msra.mxu0 %v3477_v3 }
 0xadd   :  { %3482 = vmatprep.subr.bf16.mxu0 %v3481_v7 }
 0xae0   :  { %3484 = vmatpush3.bf16.msra.mxu0 %v3481_v7 }
 0xae1   :  { %3486 = vmatprep.subr.bf16.mxu0 %v3485_v24 }
 0xae4   :  { %3488 = vmatpush3.bf16.msra.mxu0 %v3485_v24 }
 0xb9a   :  { %v3204_v34 = vpop.f32.mrb[8].mxu0 }
 0xb9b   :  { %v1116_v5 = vadd.f32 %v3204_v34, %v3934_v25  ;;  %v1106_v35 = vpop.f32.mrb[9].mxu0  ;;  %v1146_v25 = vld [vmem:[#allocation2 + $0x40] sm:$0xff] }
 0xb9c   :  { %v1115_v4 = vadd.f32 %v1106_v35, %v3928_v20  ;;  %v3449_v20 = vpack.c.bf16 %v1147_v40, %v1146_v25  ;;  %v2939_v34 = vld [vmem:[#allocation2 + $0xe3] ss:$0 sm:$0xff] }
 0xb9d   :  { %v4081_v51 = vadd.f32 %v2934_v33, %v1116_v5 }
 0xb9e   :  { %v4083_v36 = vadd.f32 %v2934_v33, %v1115_v4  ;;  %3450 = vmatprep.subr.bf16.mxu1 %v3449_v20 }
 0xb9f   :  { %v1125_v49 = vmul.f32 %v4081_v51, %v4081_v51  ;;  %3452 = vmatpush3.bf16.msra.mxu1 %v3449_v20  ;;  %v1364_v20 = vld [vmem:[#allocation2 + $0xf8] sm:$0xff] }
 0xba0   :  { %v1124_v37 = vmul.f32 %v4083_v36, %v4083_v36  ;;  %3454 = vmatprep.subr.bf16.mxu1 %v3453_v43 }
 0xba1   :  { %v1129_v38 = vsel %vm87_vm1, %v1125_v49, 0.0 }
 0xba2   :  { %1130 = vadd.xlane.f32.xlu1 %v1129_v38  ;;  %v1126_v39 = vsel %vm87_vm1, %v1124_v37, 0.0 }
 0xba3   :  { %1127 = vadd.xlane.f32.xlu0 %v1126_v39  ;;  %3456 = vmatpush3.bf16.msra.mxu1 %v3453_v43  ;;  %v3493_v43 = vpack.c.bf16 %v1365_v42, %v1364_v20 }
 0xc2f   :  { %v1131_v6 = vpop.xlane.xlu1 %1130 }
 0xc30   :  { %v1133_v10 = vmul.f32 0.03125, %v1131_v6  ;;  %v1128_v11 = vpop.xlane.xlu0 %1127 }
 0xc31   :  { %v1132_v52 = vmul.f32 0.03125, %v1128_v11 }
 0xc32   :  { %v1135_v12 = vadd.f32 1e-06, %v1133_v10 }
 0xc33   :  { %v1134_v13 = vadd.f32 1e-06, %v1132_v52 }
 0xc34   :  { %3733 = vrsqrt.f32 %v1135_v12 }
 0xc35   :  { %3735 = vrsqrt.f32 %v1134_v13 }
 0xc3e   :  { %v3734_v14 = vpop.eup %3733 }
 0xc3f   :  { %v3736_v15 = vpop.eup %3735  ;;  %v1139_v17 = vmul.f32 %v3734_v14, %v4081_v51 }
 0xc40   :  { %v1138_v18 = vmul.f32 %v3736_v15, %v4083_v36 }
 0xc41   :  { %v1145_v21 = vmul.f32 %v2935_v16, %v1139_v17 }
 0xc42   :  { %v1144_v19 = vmul.f32 %v2935_v16, %v1138_v18 }
 0xc44   :  { %3213 = vmatprep.mubr.msk.f32.mxu1 %vm87_vm1, %v1144_v19 }
 0xc45   :  { %3214 = vmatmul.mubr.msk.f32.vlgmr.msra.gmra.mrb[10].mxu1 %vm87_vm1, %v1145_v21 }
 0xd18   :  { %v3215_v27 = vpop.f32.mrb[10].mxu1 }
 0xd19   :  { %v1250_v28 = vadd.f32 %v3215_v27, %v2936_v26  ;;  %v1244_v29 = vpop.f32.mrb[11].mxu1 }
 0xd1a   :  { %v1245_v30 = vadd.f32 %v2936_v26, %v1244_v29 }
 0xd1b   :  { %v1254_v32 = vmax.f32 %v1250_v28, 0.0 }
 0xd1c   :  { %v1253_v31 = vmax.f32 %v1245_v30, 0.0 }
 0xd1e   :  { %3248 = vmatprep.mubr.f32.mxu0 %v1253_v31 }
 0xd1f   :  { %3249 = vmatmul.mubr.f32.vlgmr.msra.gmra.mrb[10].mxu0 %v1254_v32 }
 0xdf2   :  { %v3250_v33 = vpop.f32.mrb[10].mxu0 }
 0xdf3   :  { %v1331_v5 = vadd.f32 %v3250_v33, %v4081_v51  ;;  %v1321_v35 = vpop.f32.mrb[11].mxu0  ;;  %v1362_v51 = vld [vmem:[#allocation2 + $0xe8] sm:$0xff] }
 0xdf4   :  { %v1330_v4 = vadd.f32 %v1321_v35, %v4083_v36  ;;  %v3489_v36 = vpack.c.bf16 %v1363_v41, %v1362_v51 }
 0xdf5   :  { %v4097_v49 = vadd.f32 %v2939_v34, %v1331_v5 }
 0xdf6   :  { %v4099_v37 = vadd.f32 %v2939_v34, %v1330_v4  ;;  %3490 = vmatprep.subr.bf16.mxu1 %v3489_v36 }
 0xdf7   :  { %v1341_v25 = vmul.f32 %v4097_v49, %v4097_v49  ;;  %3492 = vmatpush3.bf16.msra.mxu1 %v3489_v36 }
 0xdf8   :  { %v1340_v38 = vmul.f32 %v4099_v37, %v4099_v37  ;;  %3494 = vmatprep.subr.bf16.mxu1 %v3493_v43 }
 0xdf9   :  { %v1345_v40 = vsel %vm87_vm1, %v1341_v25, 0.0 }
 0xdfa   :  { %v1342_v39 = vsel %vm87_vm1, %v1340_v38, 0.0 }
 0xdfb   :  { %1343 = vadd.xlane.f32.xlu0 %v1342_v39  ;;  %3496 = vmatpush3.bf16.msra.mxu1 %v3493_v43 }
 0xdff   :  { %1346 = vadd.xlane.f32.xlu0 %v1345_v40 }
 0xe88   :  { %v1344_v44 = vpop.xlane.xlu0 %1343 }
 0xe89   :  { %v1348_v45 = vmul.f32 0.03125, %v1344_v44 }
 0xe8b   :  { %v1350_v46 = vadd.f32 1e-06, %v1348_v45 }
 0xe8c   :  { %v1347_v47 = vpop.xlane.xlu0 %1346 }
 0xe8d   :  { %3737 = vrsqrt.f32 %v1350_v46  ;;  %v1349_v48 = vmul.f32 0.03125, %v1347_v47 }
 0xe8f   :  { %v1351_v50 = vadd.f32 1e-06, %v1349_v48 }
 0xe91   :  { %3739 = vrsqrt.f32 %v1351_v50 }
 0xe97   :  { %v3738_v53 = vpop.eup %3737 }
 0xe98   :  { %v1354_v55 = vmul.f32 %v3738_v53, %v4099_v37 }
 0xe9a   :  { %v1360_v56 = vmul.f32 %v2940_v54, %v1354_v55 }
 0xe9b   :  { %v3740_v57 = vpop.eup %3739 }
 0xe9c   :  { %v1355_v58 = vmul.f32 %v3740_v57, %v4097_v49  ;;  %3259 = vmatprep.mubr.msk.f32.mxu1 %vm87_vm1, %v1360_v56 }
 0xe9e   :  { %v1361_v60 = vmul.f32 %v2940_v54, %v1355_v58 }
 0xea0   :  { %3260 = vmatmul.mubr.msk.f32.vlgmr.msra.gmra.mrb[12].mxu1 %vm87_vm1, %v1361_v60 }
 0xf73   :  { %v3261_v62 = vpop.f32.mrb[12].mxu1 }
 0xf74   :  { %v4111_v63 = vadd.f32 %v3261_v62, %v2941_v61  ;;  %v1443_v2 = vpop.f32.mrb[13].mxu1 }
 0xf75   :  { %v4113_v3 = vadd.f32 %v2941_v61, %v1443_v2 }
 0xf77   :  { %3266 = vmatprep.mubr.msk.f32.mxu1 %vm205_vm2, %v4113_v3  ;;  %v4119_v8 = vpack.i.bf16 %v4111_v63, %v4113_v3 }
 0xf79   :  { %3656 = vrot.lane.b32.xlu1 %v4119_v8, %s3849_s2 }
 0xf7d   :  { %3661 = vrot.lane.b32.xlu1 %v4119_v8, %s3851_s21 }
 0xf81   :  { %1650 = vrot.lane.b32.xlu1 %v4113_v3, %s3850_s16 }
 0xf85   :  { %3671 = vrot.lane.b32.xlu1 %v4119_v8, %s3852_s22 }
 0xf89   :  { %1652 = vrot.lane.b32.xlu1 %v4111_v63, %s3850_s16 }
 0xf8d   :  { %1850 = vrot.lane.b32.xlu1 %v4113_v3, %s3847_s10 }
 0xf91   :  { %1852 = vrot.lane.b32.xlu1 %v4111_v63, %s3847_s10 }
 0xfeb   :  { %v3657_v9 = vpop.permute.xlu1 %3656 }
 0xfec   :  { %v3659_v7 = vunpack.i.h.bf16 %v3657_v9  ;;  %v3658_v6 = vunpack.i.l.bf16 %v3657_v9 }
 0xfee   :  { %v3497_v10 = vpack.c.bf16 %v3659_v7, %v3658_v6 }
 0xfef   :  { %v3662_v11 = vpop.permute.xlu1 %3661 }
 0xff0   :  { %v3664_v52 = vunpack.i.h.bf16 %v3662_v11  ;;  %v3663_v12 = vunpack.i.l.bf16 %v3662_v11  ;;  %3499 = vmatprep.subr.msk.bf16.mxu1 %vm3963_vm3, %v3497_v10 }
 0xff1   :  { %3502 = vmatpush3.bf16.xpose.msk.msra.mxu1 %vm3963_vm3, %v3497_v10 }
 0xff2   :  { %v3503_v13 = vpack.c.bf16 %v3664_v52, %v3663_v12 }
 0xff3   :  { %v1651_v14 = vpop.permute.xlu1 %1650 }
 0xff4   :  { %3504 = vmatprep.subr.bf16.mxu1 %v3503_v13 }
 0xff7   :  { %v3672_v15 = vpop.permute.xlu1 %3671 }
 0xff8   :  { %v3674_v16 = vunpack.i.h.bf16 %v3672_v15  ;;  %v3673_v17 = vunpack.i.l.bf16 %v3672_v15  ;;  %3267 = vmatmul.mubr.msk.f32.vlgmr.msra.gmra.mrb[14].mxu1 %vm205_vm2, %v4111_v63 }
 0xff9   :  { %3506 = vmatpush3.bf16.msra.mxu1 %v3503_v13 }
 0xffa   :  { %v3517_v18 = vpack.c.bf16 %v3674_v16, %v3673_v17 }
 0xffb   :  { %v1653_v19 = vpop.permute.xlu1 %1652 }
 0xffc   :  { %3519 = vmatprep.subr.msk.bf16.mxu0 %vm3963_vm3, %v3517_v18 }
 0xffd   :  { %3522 = vmatpush3.bf16.xpose.msk.msra.mxu0 %vm3963_vm3, %v3517_v18 }
 0xfff   :  { %v1851_v21 = vpop.permute.xlu1 %1850 }
0x1000   :  { %3294 = vmatprep.mubr.msk.f32.mxu0 %vm205_vm2, %v1851_v21 }
0x1003   :  { %v1853_v22 = vpop.permute.xlu1 %1852 }
0x1004   :  { %3295 = vmatmul.mubr.msk.f32.vlgmr.msra.gmra.mrb[12].mxu0 %vm205_vm2, %v1853_v22 }
0x10cb   :  { %v3268_v23 = vpop.f32.mrb[14].mxu1 }
0x10cc   :  { %v1532_v24 = vpop.f32.mrb[15].mxu1  ;;  %v1538_v27 = vadd.f32 %v3268_v23, %v3982_v0 }
0x10cd   :  { %v1533_v26 = vadd.f32 %v1532_v24, %v3987_v1 }
0x10ce   :  { %v1544_v29 = vsel %vm79_vm0, %v1538_v27, -inf }
0x10cf   :  { %v1541_v28 = vsel %vm79_vm0, %v1533_v26, -inf }
0x10d0   :  { %1542 = vmax.xlane.f32.xlu0 %v1541_v28 }
0x10d4   :  { %1545 = vmax.xlane.f32.xlu0 %v1544_v29 }
0x10d7   :  { %v3296_v30 = vpop.f32.mrb[12].mxu0 }
0x10d8   :  { %v1932_v31 = vpop.f32.mrb[13].mxu0  ;;  %v1938_v61 = vadd.f32 %v3296_v30, %v3982_v0 }
0x10d9   :  { %v1933_v58 = vadd.f32 %v1932_v31, %v3987_v1 }
0x10da   :  { %v1944_v2 = vsel %vm79_vm0, %v1938_v61, -inf }
0x10db   :  { %v1941_v62 = vsel %vm79_vm0, %v1933_v58, -inf }
0x115d   :  { %v1543_v32 = vpop.xlane.xlu0 %1542 }
0x115e   :  { %v1547_v33 = vsub.f32 %v1533_v26, %v1543_v32 }
0x1160   :  { %v1549_v35 = vmul.f32 1.442695, %v1547_v33 }
0x1161   :  { %v1546_v34 = vpop.xlane.xlu0 %1545 }
0x1162   :  { %v1548_v5 = vsub.f32 %v1538_v27, %v1546_v34 }
0x1164   :  { %v1551_v4 = vmul.f32 1.442695, %v1548_v5 }
0x1166   :  { %3741 = vpow2.f32 %v1551_v4 }
0x1167   :  { %3743 = vpow2.f32 %v1549_v35 }
0x1170   :  { %v3742_v38 = vpop.eup %3741 }
0x1171   :  { %v1556_v39 = vsel %vm79_vm0, %v3742_v38, 0.0  ;;  %v3744_v25 = vpop.eup %3743 }
0x1172   :  { %1557 = vadd.xlane.f32.xlu0 %v1556_v39  ;;  %v1553_v40 = vsel %vm79_vm0, %v3744_v25, 0.0 }
0x1176   :  { %1554 = vadd.xlane.f32.xlu0 %v1553_v40 }
0x118c   :  { %3666 = vrot.lane.b32.xlu0 %v4119_v8, %s3848_s0 }
0x11ff   :  { %v1558_v51 = vpop.xlane.xlu0 %1557 }
0x1200   :  { %3745 = vrcp.f32 %v1558_v51 }
0x1203   :  { %v1555_v41 = vpop.xlane.xlu0 %1554 }
0x1204   :  { %3747 = vrcp.f32 %v1555_v41 }
0x1207   :  { %v3667_v20 = vpop.permute.xlu0 %3666 }
0x1208   :  { %v3669_v36 = vunpack.i.h.bf16 %v3667_v20  ;;  %v3668_v42 = vunpack.i.l.bf16 %v3667_v20 }
0x120a   :  { %v3507_v43 = vpack.c.bf16 %v3669_v36, %v3668_v42  ;;  %v3746_v44 = vpop.eup %3745 }
0x120b   :  { %v1562_v47 = vmul.f32 %v3746_v44, %v3742_v38 }
0x120c   :  { %3509 = vmatprep.subr.msk.bf16.mxu1 %vm3963_vm3, %v3507_v43 }
0x120e   :  { %v3748_v45 = vpop.eup %3747 }
0x120f   :  { %v1561_v46 = vmul.f32 %v3748_v45, %v3744_v25 }
0x1211   :  { %3273 = vmatprep.mubr.msk.f32.mxu1 %vm79_vm0, %v1561_v46 }
0x1212   :  { %3274 = vmatmul.mubr.msk.f32.vlgmr.msra.gmra.mrb[16].mxu1 %vm79_vm0, %v1562_v47 }
0x1213   :  { %3512 = vmatpush3.bf16.xpose.msk.msra.mxu1 %vm3963_vm3, %v3507_v43  ;;  %3280 = vmatprep.mubr.msk.f32.mxu1 %vm205_vm2, %v1651_v14 }
0x121a   :  { %3281 = vmatmul.mubr.msk.f32.vlgmr.msra.gmra.mrb[18].mxu1 %vm205_vm2, %v1653_v19 }
0x12e5   :  { %v4163_v48 = vpop.f32.mrb[16].mxu1 }
0x12e6   :  { %v4165_v50 = vpop.f32.mrb[17].mxu1 }
0x12ed   :  { %v3282_v53 = vpop.f32.mrb[18].mxu1 }
0x12ee   :  { %v1738_v54 = vadd.f32 %v3282_v53, %v3982_v0  ;;  %v1732_v55 = vpop.f32.mrb[19].mxu1 }
0x12ef   :  { %v1733_v56 = vadd.f32 %v1732_v55, %v3987_v1 }
0x12f0   :  { %v1744_v57 = vsel %vm79_vm0, %v1738_v54, -inf }
0x12f1   :  { %1745 = vmax.xlane.f32.xlu1 %v1744_v57  ;;  %v1741_v60 = vsel %vm79_vm0, %v1733_v56, -inf }
0x12f2   :  { %1742 = vmax.xlane.f32.xlu0 %v1741_v60  ;;  %v3794_v60 = vld [vmem:[%s4315_s1] sm:$0xff] }
0x12f6   :  { %1942 = vmax.xlane.f32.xlu0 %v1941_v62 }
0x12fa   :  { %1945 = vmax.xlane.f32.xlu0 %v1944_v2 }
0x137e   :  { %v1746_v7 = vpop.xlane.xlu1 %1745 }
0x137f   :  { %v1743_v9 = vpop.xlane.xlu0 %1742  ;;  %v1748_v11 = vsub.f32 %v1738_v54, %v1746_v7 }
0x1380   :  { %v1747_v21 = vsub.f32 %v1733_v56, %v1743_v9  ;;  %v3793_v56 = vld [vmem:[%s4315_s1 + $0x8] sm:$0xff] }
0x1381   :  { %v1751_v13 = vmul.f32 1.442695, %v1748_v11 }
0x1382   :  { %v1749_v22 = vmul.f32 1.442695, %v1747_v21 }
0x1383   :  { %v1943_v6 = vpop.xlane.xlu0 %1942 }
0x1384   :  { %v1947_v10 = vsub.f32 %v1933_v58, %v1943_v6 }
0x1386   :  { %v1949_v52 = vmul.f32 1.442695, %v1947_v10 }
0x1387   :  { %v1946_v12 = vpop.xlane.xlu0 %1945 }
0x1388   :  { %3749 = vpow2.f32 %v1949_v52  ;;  %v1948_v1 = vsub.f32 %v1938_v61, %v1946_v12 }
0x138a   :  { %v1951_v14 = vmul.f32 1.442695, %v1948_v1 }
0x138c   :  { %3751 = vpow2.f32 %v1951_v14 }
0x138d   :  { %3753 = vpow2.f32 %v1751_v13 }
0x138e   :  { %3755 = vpow2.f32 %v1749_v22 }
0x1392   :  { %v3750_v0 = vpop.eup %3749 }
0x1393   :  { %v1953_v15 = vsel %vm79_vm0, %v3750_v0, 0.0 }
0x1394   :  { %1954 = vadd.xlane.f32.xlu1 %v1953_v15 }
0x1396   :  { %v3752_v16 = vpop.eup %3751 }
0x1397   :  { %v1956_v17 = vsel %vm79_vm0, %v3752_v16, 0.0  ;;  %v3754_v18 = vpop.eup %3753 }
0x1398   :  { %1957 = vadd.xlane.f32.xlu0 %v1956_v17  ;;  %v1756_v19 = vsel %vm79_vm0, %v3754_v18, 0.0  ;;  %v3756_v23 = vpop.eup %3755 }
0x1399   :  { %v1753_v24 = vsel %vm79_vm0, %v3756_v23, 0.0 }
0x139c   :  { %1757 = vadd.xlane.f32.xlu0 %v1756_v19 }
0x13a5   :  { %3676 = vrot.lane.b32.xlu1 %v4119_v8, %s3853_s23 }
0x13b2   :  { %3681 = vrot.lane.b32.xlu0 %v4119_v8, %s3856_s26  ;;  %s3863_s26 = smov [#allocation5]  }
0x13b6   :  { %2052 = vrot.lane.b32.xlu0 %v4111_v63, %s3855_s25 }
0x13c9   :  { %1754 = vadd.xlane.f32.xlu1 %v1753_v24  ;;  %v2281_v24 = vld [vmem:[#allocation2 + $0x110] sm:$0xff] }
0x13da   :  { %3686 = vrot.lane.b32.xlu1 %v4119_v8, %s3854_s24 }
0x13de   :  { %2050 = vrot.lane.b32.xlu1 %v4113_v3, %s3855_s25 }
0x1421   :  { %v1955_v26 = vpop.xlane.xlu1 %1954 }
0x1422   :  { %3757 = vrcp.f32 %v1955_v26  ;;  %v2282_v26 = vld [vmem:[#allocation2 + $0x118] sm:$0xff] }
0x1425   :  { %v3677_v27 = vpop.permute.xlu1 %3676  ;;  %v1958_v28 = vpop.xlane.xlu0 %1957 }
0x1426   :  { %v3679_v29 = vunpack.i.h.bf16 %v3677_v27  ;;  %v3678_v30 = vunpack.i.l.bf16 %v3677_v27 }
0x1428   :  { %v3513_v31 = vpack.c.bf16 %v3679_v29, %v3678_v30 }
0x1429   :  { %v1758_v32 = vpop.xlane.xlu0 %1757 }
0x142a   :  { %3514 = vmatprep.subr.bf16.mxu1 %v3513_v31  ;;  %3759 = vrcp.f32 %v1758_v32 }
0x142b   :  { %3516 = vmatpush3.bf16.msra.mxu1 %v3513_v31 }
0x142c   :  { %v3758_v4 = vpop.eup %3757 }
0x142d   :  { %v3682_v63 = vpop.permute.xlu0 %3681  ;;  %v1961_v36 = vmul.f32 %v3758_v4, %v3750_v0 }
0x142e   :  { %v3684_v33 = vunpack.i.h.bf16 %v3682_v63  ;;  %v3683_v34 = vunpack.i.l.bf16 %v3682_v63 }
0x1430   :  { %v3523_v5 = vpack.c.bf16 %v3684_v33, %v3683_v34 }
0x1431   :  { %v2053_v45 = vpop.permute.xlu0 %2052 }
0x1432   :  { %3524 = vmatprep.subr.bf16.mxu1 %v3523_v5 }
0x1434   :  { %v3760_v38 = vpop.eup %3759 }
0x1435   :  { %v1762_v41 = vmul.f32 %v3760_v38, %v3754_v18 }
0x1456   :  { %v1755_v35 = vpop.xlane.xlu1 %1754 }
0x1457   :  { %3761 = vrcp.f32 %v1755_v35 }
0x1458   :  { %3763 = vrcp.f32 %v1958_v28  ;;  %v2283_v28 = vld [vmem:[#allocation2 + $0x120] sm:$0xff] }
0x1459   :  { %v3541_v29 = vpack.c.bf16 %v2283_v28, %v2282_v26  ;;  %v2971_v26 = vld [vmem:[#allocation2 + $0x1cd] ss:$0 sm:$0xff] }
0x145a   :  { %v3687_v3 = vpop.permute.xlu1 %3686 }
0x145b   :  { %v3689_v25 = vunpack.i.h.bf16 %v3687_v3  ;;  %v3688_v40 = vunpack.i.l.bf16 %v3687_v3 }
0x145d   :  { %v3527_v42 = vpack.c.bf16 %v3689_v25, %v3688_v40 }
0x145e   :  { %v2051_v44 = vpop.permute.xlu1 %2050 }
0x1461   :  { %v3762_v39 = vpop.eup %3761 }
0x1462   :  { %v1761_v51 = vmul.f32 %v3762_v39, %v3756_v23  ;;  %v3764_v20 = vpop.eup %3763 }
0x1463   :  { %v1962_v43 = vmul.f32 %v3764_v20, %v3752_v16 }
0x1464   :  { %3287 = vmatprep.mubr.msk.f32.mxu1 %vm79_vm0, %v1761_v51  ;;  %v2970_v51 = vld [vmem:[#allocation2 + $0x1c9] ss:$0 sm:$0xff] }
0x1465   :  { %3288 = vmatmul.mubr.msk.f32.vlgmr.msra.gmra.mrb[20].mxu1 %vm79_vm0, %v1762_v41 }
0x1466   :  { %3526 = vmatpush3.bf16.msra.mxu1 %v3523_v5  ;;  %3301 = vmatprep.mubr.msk.f32.mxu1 %vm79_vm0, %v1961_v36 }
0x1467   :  { %3529 = vmatprep.subr.msk.bf16.mxu1 %vm3963_vm3, %v3527_v42 }
0x1469   :  { %3302 = vmatmul.mubr.msk.f32.vlgmr.msra.gmra.mrb[22].mxu1 %vm79_vm0, %v1962_v43 }
0x146a   :  { %3308 = vmatprep.mubr.msk.f32.mxu1 %vm205_vm2, %v2051_v44 }
0x146f   :  { %3532 = vmatpush3.bf16.xpose.msk.msra.mxu1 %vm3963_vm3, %v3527_v42 }
0x1476   :  { %3309 = vmatmul.mubr.msk.f32.vlgmr.msra.gmra.mrb[24].mxu1 %vm205_vm2, %v2053_v45 }
0x1538   :  { %v3289_v46 = vpop.f32.mrb[20].mxu1 }
0x1539   :  { %v1841_v47 = vpop.f32.mrb[21].mxu1 }
0x153c   :  { %v3303_v53 = vpop.f32.mrb[22].mxu1 }
0x153d   :  { %v2041_v54 = vpop.f32.mrb[23].mxu1 }
0x1549   :  { %v3310_v55 = vpop.f32.mrb[24].mxu1 }
0x154a   :  { %v2138_v57 = vadd.f32 %v3793_v56, %v3310_v55  ;;  %v2132_v58 = vpop.f32.mrb[25].mxu1  ;;  %v2402_v56 = vld [vmem:[#allocation2 + $0x148] sm:$0xff] }
0x154b   :  { %v2133_v59 = vadd.f32 %v3794_v60, %v2132_v58  ;;  %v2404_v58 = vld [vmem:[#allocation2 + $0x158] sm:$0xff] }
0x154c   :  { %v2144_v61 = vsel %vm79_vm0, %v2138_v57, -inf }
0x154d   :  { %2145 = vmax.xlane.f32.xlu0 %v2144_v61  ;;  %v2141_v62 = vsel %vm79_vm0, %v2133_v59, -inf }
0x154e   :  { %2142 = vmax.xlane.f32.xlu1 %v2141_v62  ;;  %v2406_v62 = vld [vmem:[#allocation2 + $0x168] sm:$0xff] }
0x15da   :  { %v2146_v2 = vpop.xlane.xlu0 %2145 }
0x15db   :  { %v2148_v9 = vsub.f32 %v2138_v57, %v2146_v2  ;;  %v2143_v7 = vpop.xlane.xlu1 %2142  ;;  %v2403_v57 = vld [vmem:[#allocation2 + $0x150] sm:$0xff] }
0x15dc   :  { %v2147_v6 = vsub.f32 %v2133_v59, %v2143_v7  ;;  %v3553_v60 = vpack.c.bf16 %v2403_v57, %v2402_v56  ;;  %v2405_v59 = vld [vmem:[#allocation2 + $0x160] sm:$0xff]  ;;  %v2407_v2 = vld [vmem:[#allocation2 + $0x170] sm:$0xff]  ;;  %v2408_v7 = vld [vmem:[#allocation2 + $0x178] sm:$0xff] }
0x15dd   :  { %v2151_v10 = vmul.f32 1.442695, %v2148_v9  ;;  %v3557_v61 = vpack.c.bf16 %v2405_v59, %v2404_v58  ;;  %v3561_v9 = vpack.c.bf16 %v2407_v2, %v2406_v62  ;;  %v2977_v56 = vld [vmem:[%s4318_s4 + $0x31] ss:$0 sm:$0xff] }
0x15de   :  { %v2149_v11 = vmul.f32 1.442695, %v2147_v6  ;;  %v2409_v6 = vld [vmem:[#allocation2 + $0x180] sm:$0xff] }
0x15df   :  { %3765 = vpow2.f32 %v2151_v10  ;;  %v3565_v10 = vpack.c.bf16 %v2409_v6, %v2408_v7  ;;  %v3859_v7 = vmov 0   ;;  %v2978_v6 = vld [vmem:[%s4318_s4 + $0x32] ss:$0 sm:$0xff] }
0x15e0   :  { %3767 = vpow2.f32 %v2149_v11  ;;  %v2410_v11 = vld [vmem:[#allocation2 + $0x188] sm:$0xff]  ;;  %3695 = vset.pattern.permute.xlu1 %v3859_v7  ;;  %3696 = vset.pattern.permute.xlu0 %v3859_v7 }
0x15e9   :  { %v3766_v52 = vpop.eup %3765 }
0x15ea   :  { %v3768_v12 = vpop.eup %3767  ;;  %v2156_v1 = vsel %vm79_vm0, %v3766_v52, 0.0 }
0x15eb   :  { %2157 = vadd.xlane.f32.xlu1 %v2156_v1  ;;  %v2153_v13 = vsel %vm79_vm0, %v3768_v12, 0.0  ;;  %v2412_v1 = vld [vmem:[#allocation2 + $0x198] sm:$0xff] }
0x15ec   :  { %2154 = vadd.xlane.f32.xlu0 %v2153_v13  ;;  %v2413_v13 = vld [vmem:[#allocation2 + $0x1a0] sm:$0xff] }
0x15fc   :  { %2252 = vrot.lane.b32.xlu1 %v1841_v47, %s3845_s29  ;;  %v2398_v47 = vld [vmem:[#allocation2 + $0x130] sm:$0xff] }
0x1600   :  { %2254 = vrot.lane.b32.xlu1 %v3289_v46, %s3845_s29 }
0x1602   :  { %3691 = vrot.lane.b32.xlu0 %v4119_v8, %s3857_s27  ;;  %v2280_v8 = vld [vmem:[#allocation2 + $0x108] sm:$0xff]  ;;  %s2895_s27 = sshll.u32 %s3863_s26, 4  ;;  %s2896_s27 = int_to_ptr.vmem [resolvable:$true] %s2895_s27 }
0x1603   :  { %v3537_v27 = vpack.c.bf16 %v2281_v24, %v2280_v8  ;;  %p3822_p9 = scmp.lt.s32.totalorder %s2896_s27, %s2896_s27 }
0x1604   :  { %2262 = vrot.lane.b32.xlu1 %v3303_v53, %s3846_s9  ;;  %v2399_v53 = vld [vmem:[#allocation2 + $0x138] sm:$0xff] }
0x1606   :  { %2260 = vrot.lane.b32.xlu0 %v2041_v54, %s3846_s9  ;;  %v2400_v54 = vld [vmem:[#allocation2 + $0x140] sm:$0xff] }
0x1607   :  { %v3549_v55 = vpack.c.bf16 %v2400_v54, %v2399_v53 }
0x1678   :  { %v2158_v14 = vpop.xlane.xlu1 %2157 }
0x1679   :  { %3769 = vrcp.f32 %v2158_v14  ;;  %v2155_v0 = vpop.xlane.xlu0 %2154  ;;  %v3573_v14 = vpack.c.bf16 %v2413_v13, %v2412_v1 }
0x167a   :  { %3771 = vrcp.f32 %v2155_v0  ;;  %v2414_v0 = vld [vmem:[#allocation2 + $0x1a8] sm:$0xff] }
0x167c   :  { %v2253_v32 = vpop.permute.xlu1 %2252 }
0x167d   :  { %v3692_v15 = vpop.permute.xlu0 %3691  ;;  %v2274_v5 = vsel %vm205_vm2, %v4165_v50, %v2253_v32  ;;  %v2417_v32 = vld [vmem:[#allocation2 + $0x1c0] sm:$0xff] }
0x167e   :  { %v3694_v16 = vunpack.i.h.bf16 %v3692_v15  ;;  %v3693_v17 = vunpack.i.l.bf16 %v3692_v15  ;;  %v2415_v15 = vld [vmem:[#allocation2 + $0x1b0] sm:$0xff] }
0x1680   :  { %v3533_v18 = vpack.c.bf16 %v3694_v16, %v3693_v17  ;;  %v2255_v63 = vpop.permute.xlu1 %2254  ;;  %v3577_v16 = vpack.c.bf16 %v2415_v15, %v2414_v0 }
0x1681   :  { %v2261_v34 = vpop.permute.xlu0 %2260  ;;  %v2275_v3 = vsel %vm205_vm2, %v4163_v48, %v2255_v63 }
0x1682   :  { %3534 = vmatprep.subr.bf16.mxu0 %v3533_v18  ;;  %v2276_v4 = vsel %vm79_vm0, %v2274_v5, %v2261_v34 }
0x1683   :  { %v3770_v19 = vpop.eup %3769  ;;  %3536 = vmatpush3.bf16.msra.mxu0 %v3533_v18 }
0x1684   :  { %v3772_v21 = vpop.eup %3771  ;;  %v2162_v23 = vmul.f32 %v3770_v19, %v3766_v52  ;;  %3538 = vmatprep.subr.bf16.mxu0 %v3537_v27  ;;  %v2263_v33 = vpop.permute.xlu1 %2262  ;;  %v2411_v52 = vld [vmem:[#allocation2 + $0x190] sm:$0xff] }
0x1685   :  { %v2161_v22 = vmul.f32 %v3772_v21, %v3768_v12  ;;  %v2277_v39 = vsel %vm79_vm0, %v2275_v3, %v2263_v33  ;;  %v3569_v12 = vpack.c.bf16 %v2411_v52, %v2410_v11  ;;  %v2972_v33 = vld [vmem:[#allocation2 + $0x1ca] ss:$0 sm:$0xff] }
0x1687   :  { %3315 = vmatprep.mubr.msk.f32.mxu0 %vm79_vm0, %v2161_v22 }
0x1688   :  { %3316 = vmatmul.mubr.msk.f32.vlgmr.msra.gmra.mrb[14].mxu0 %vm79_vm0, %v2162_v23 }
0x1689   :  { %3540 = vmatpush3.bf16.msra.mxu0 %v3537_v27 }
0x168a   :  { %3542 = vmatprep.subr.bf16.mxu0 %v3541_v29 }
0x168d   :  { %3544 = vmatpush3.bf16.msra.mxu0 %v3541_v29 }
0x168e   :  { %3554 = vmatprep.subr.bf16.mxu0 %v3553_v60 }
0x175b   :  { %v3317_v30 = vpop.f32.mrb[14].mxu0 }
0x175c   :  { %2270 = vrot.lane.b32.xlu1 %v3317_v30, %s3858_s28  ;;  %v2241_v31 = vpop.f32.mrb[15].mxu0 }
0x175d   :  { %2268 = vrot.lane.b32.xlu0 %v2241_v31, %s3858_s28  ;;  %v2416_v31 = vld [vmem:[#allocation2 + $0x1b8] sm:$0xff]  ;;  %s3817_s28 = scalar_lea.vmem %s2896_s27, 32 }
0x175e   :  { %v3581_v63 = vpack.c.bf16 %v2417_v32, %v2416_v31  ;;  %p3818_p8 = scmp.ne.s32.totalorder %s2896_s27, %s3817_s28  ;;  %p3823_p10 = scmp.lt.s32.totalorder %s3817_s28, %s3817_s28 }
0x1760   :  { %p3824_p11 = por %p3823_p10, %p3822_p9 }
0x1762   :  { %p3825_p12 = pnand %p3824_p11, %p3818_p8 }
0x17ce   :  { %v2271_v35 = vpop.permute.xlu1 %2270 }
0x17cf   :  { %v2269_v38 = vpop.permute.xlu0 %2268  ;;  %v2279_v40 = vsel %vm1026_vm4, %v2277_v39, %v2271_v35 }
0x17d0   :  { %v2278_v25 = vsel %vm1026_vm4, %v2276_v4, %v2269_v38 }
0x17d1   :  { %3326 = vmatprep.mubr.msk.f32.mxu0 %vm87_vm1, %v2278_v25  ;;  %v2975_v25 = vld [vmem:[#allocation2 + $0x1cb] ss:$0 sm:$0xff] }
0x17d2   :  { %3327 = vmatmul.mubr.msk.f32.vlgmr.msra.gmra.mrb[16].mxu0 %vm87_vm1, %v2279_v40 }
0x17d3   :  { %3556 = vmatpush3.bf16.msra.mxu0 %v3553_v60 }
0x17d4   :  { %3558 = vmatprep.subr.bf16.mxu0 %v3557_v61 }
0x17d7   :  { %3560 = vmatpush3.bf16.msra.mxu0 %v3557_v61 }
0x17d8   :  { %3562 = vmatprep.subr.bf16.mxu0 %v3561_v9 }
0x17db   :  { %3564 = vmatpush3.bf16.msra.mxu0 %v3561_v9 }
0x17dc   :  { %3566 = vmatprep.subr.bf16.mxu0 %v3565_v10 }
0x17df   :  { %3568 = vmatpush3.bf16.msra.mxu0 %v3565_v10 }
0x17e0   :  { %3570 = vmatprep.subr.bf16.mxu0 %v3569_v12 }
0x17e3   :  { %3572 = vmatpush3.bf16.msra.mxu0 %v3569_v12 }
0x17e4   :  { %3574 = vmatprep.subr.bf16.mxu0 %v3573_v14 }
0x17e7   :  { %3576 = vmatpush3.bf16.msra.mxu0 %v3573_v14 }
0x17e8   :  { %3578 = vmatprep.subr.bf16.mxu0 %v3577_v16 }
0x17eb   :  { %3580 = vmatpush3.bf16.msra.mxu0 %v3577_v16 }
0x17ec   :  { %3582 = vmatprep.subr.bf16.mxu0 %v3581_v63 }
0x17ef   :  { %3584 = vmatpush3.bf16.msra.mxu0 %v3581_v63 }
0x18a5   :  { %v3328_v41 = vpop.f32.mrb[16].mxu0 }
0x18a6   :  { %v2367_v50 = vadd.f32 %v3328_v41, %v4097_v49  ;;  %v2357_v20 = vpop.f32.mrb[17].mxu0  ;;  %v2397_v49 = vld [vmem:[#allocation2 + $0x128] sm:$0xff] }
0x18a7   :  { %v2366_v48 = vadd.f32 %v2357_v20, %v4099_v37  ;;  %v3545_v37 = vpack.c.bf16 %v2398_v47, %v2397_v49 }
0x18a8   :  { %v4231_v36 = vadd.f32 %v2970_v51, %v2367_v50 }
0x18a9   :  { %v4233_v42 = vadd.f32 %v2970_v51, %v2366_v48  ;;  %3546 = vmatprep.subr.bf16.mxu1 %v3545_v37 }
0x18aa   :  { %v2376_v43 = vmul.f32 %v4231_v36, %v4231_v36  ;;  %3548 = vmatpush3.bf16.msra.mxu1 %v3545_v37 }
0x18ab   :  { %v2375_v44 = vmul.f32 %v4233_v42, %v4233_v42  ;;  %3550 = vmatprep.subr.bf16.mxu1 %v3549_v55 }
0x18ac   :  { %v2380_v45 = vsel %vm87_vm1, %v2376_v43, 0.0 }
0x18ad   :  { %2381 = vadd.xlane.f32.xlu1 %v2380_v45  ;;  %v2377_v46 = vsel %vm87_vm1, %v2375_v44, 0.0 }
0x18ae   :  { %2378 = vadd.xlane.f32.xlu0 %v2377_v46  ;;  %3552 = vmatpush3.bf16.msra.mxu1 %v3549_v55 }
0x193a   :  { %v2382_v17 = vpop.xlane.xlu1 %2381 }
0x193b   :  { %v2384_v18 = vmul.f32 0.03125, %v2382_v17  ;;  %v2379_v19 = vpop.xlane.xlu0 %2378 }
0x193c   :  { %v2383_v21 = vmul.f32 0.03125, %v2379_v19 }
0x193d   :  { %v2386_v22 = vadd.f32 1e-06, %v2384_v18 }
0x193e   :  { %v2385_v23 = vadd.f32 1e-06, %v2383_v21 }
0x193f   :  { %3773 = vrsqrt.f32 %v2386_v22 }
0x1940   :  { %3775 = vrsqrt.f32 %v2385_v23 }
0x1949   :  { %v3774_v8 = vpop.eup %3773 }
0x194a   :  { %v3776_v24 = vpop.eup %3775  ;;  %v2390_v27 = vmul.f32 %v3774_v8, %v4231_v36 }
0x194b   :  { %v2389_v28 = vmul.f32 %v3776_v24, %v4233_v42 }
0x194c   :  { %v2396_v30 = vmul.f32 %v2971_v26, %v2390_v27 }
0x194d   :  { %v2395_v29 = vmul.f32 %v2971_v26, %v2389_v28 }
0x194f   :  { %3337 = vmatprep.mubr.msk.f32.mxu1 %vm87_vm1, %v2395_v29 }
0x1950   :  { %3338 = vmatmul.mubr.msk.f32.vlgmr.msra.gmra.mrb[26].mxu1 %vm87_vm1, %v2396_v30 }
0x1a23   :  { %v3339_v34 = vpop.f32.mrb[26].mxu1 }
0x1a24   :  { %v2501_v5 = vadd.f32 %v3339_v34, %v2972_v33  ;;  %v2495_v35 = vpop.f32.mrb[27].mxu1 }
0x1a25   :  { %v2496_v3 = vadd.f32 %v2972_v33, %v2495_v35 }
0x1a26   :  { %v2505_v38 = vmax.f32 %v2501_v5, 0.0 }
0x1a27   :  { %v2504_v4 = vmax.f32 %v2496_v3, 0.0 }
0x1a29   :  { %3372 = vmatprep.mubr.f32.mxu0 %v2504_v4 }
0x1a2a   :  { %3373 = vmatmul.mubr.f32.vlgmr.msra.gmra.mrb[18].mxu0 %v2505_v38 }
0x1afd   :  { %v3374_v39 = vpop.f32.mrb[18].mxu0 }
0x1afe   :  { %v2582_v40 = vadd.f32 %v3374_v39, %v4231_v36  ;;  %v2572_v51 = vpop.f32.mrb[19].mxu0 }
0x1aff   :  { %v2581_v41 = vadd.f32 %v2572_v51, %v4233_v42  ;;  %v2976_v42 = vld [vmem:[%s4318_s4 + $0x30] ss:$0 sm:$0xff] }
0x1b00   :  { %v2588_v50 = vadd.f32 %v2975_v25, %v2582_v40 }
0x1b01   :  { %v2587_v20 = vadd.f32 %v2975_v25, %v2581_v41 }
0x1b02   :  { %v2591_v44 = vmul.f32 %v2588_v50, %v2588_v50 }
0x1b03   :  { %v2590_v48 = vmul.f32 %v2587_v20, %v2587_v20 }
0x1b04   :  { %v2595_v45 = vsel %vm87_vm1, %v2591_v44, 0.0  ;;  %v2699_v44 = vld [vmem:[%s4318_s4] sm:$0xff] }
0x1b05   :  { %v2592_v43 = vsel %vm87_vm1, %v2590_v48, 0.0 }
0x1b06   :  { %2593 = vadd.xlane.f32.xlu0 %v2592_v43 }
0x1b0a   :  { %2596 = vadd.xlane.f32.xlu0 %v2595_v45  ;;  %v2700_v45 = vld [vmem:[%s4318_s4 + $0x8] sm:$0xff] }
0x1b93   :  { %v2594_v46 = vpop.xlane.xlu0 %2593 }
0x1b94   :  { %v2598_v49 = vmul.f32 0.03125, %v2594_v46  ;;  %v3586_v46 = vpack.c.bf16 %v2700_v45, %v2699_v44 }
0x1b96   :  { %v2600_v47 = vadd.f32 1e-06, %v2598_v49  ;;  %v3860_v49 = vmov 0.0|0.0  }
0x1b97   :  { %v2597_v53 = vpop.xlane.xlu0 %2596  ;;  %3585 = vmatprep.subr.bf16.mxu1 %v3860_v49 }
0x1b98   :  { %3777 = vrsqrt.f32 %v2600_v47  ;;  %v2599_v37 = vmul.f32 0.03125, %v2597_v53  ;;  %3587 = vmatpush3.bf16.msra.mxu1 %v3586_v46  ;;  %v2701_v47 = vld [vmem:[%s4318_s4 + $0x10] sm:$0xff]  ;;  %v2702_v53 = vld [vmem:[%s4318_s4 + $0x18] sm:$0xff] }
0x1b99   :  { %3588 = vmatprep.subr.bf16.mxu1 %v3860_v49 }
0x1b9a   :  { %v2601_v36 = vadd.f32 1e-06, %v2599_v37  ;;  %v3589_v37 = vpack.c.bf16 %v2702_v53, %v2701_v47 }
0x1b9c   :  { %3779 = vrsqrt.f32 %v2601_v36  ;;  %3590 = vmatpush3.bf16.msra.mxu1 %v3589_v37  ;;  %v3862_v36 = vmov 0.0  }
0x1b9d   :  { %3383 = vmatprep.mubr.msk.f32.mxu1 %vm3861_vm6, %v3862_v36  ;;  %3591 = vmatprep.subr.bf16.mxu1 %v3860_v49 }
0x1ba2   :  { %v3778_v54 = vpop.eup %3777 }
0x1ba3   :  { %v2604_v55 = vmul.f32 %v3778_v54, %v2587_v20 }
0x1ba5   :  { %v4255_v57 = vmul.f32 %v2976_v42, %v2604_v55 }
0x1ba6   :  { %v3780_v58 = vpop.eup %3779 }
0x1ba7   :  { %v2618_v60 = vmul.f32 %v2977_v56, %v4255_v57  ;;  %v2605_v59 = vmul.f32 %v3780_v58, %v2588_v50 }
0x1ba9   :  { %v2619_v61 = vsel %vm87_vm1, %v2618_v60, 0.0  ;;  %v4259_v62 = vmul.f32 %v2976_v42, %v2605_v59 }
0x1baa   :  { %2620 = vadd.xlane.f32.xlu1 %v2619_v61 }
0x1bab   :  { %v2660_v2 = vmul.f32 %v2977_v56, %v4259_v62 }
0x1bad   :  { %v2661_v9 = vsel %vm87_vm1, %v2660_v2, 0.0 }
0x1bae   :  { %2662 = vadd.xlane.f32.xlu0 %v2661_v9 }
0x1c37   :  { %v2621_v10 = vpop.xlane.xlu1 %2620 }
0x1c38   :  { %v2626_v11 = vadd.f32 %v2978_v6, %v2621_v10 }
0x1c3a   :  { %v2628_v52 = vsel %vm2627_vm5, %v2626_v11, -inf }
0x1c3b   :  { %v2629_v12 = vrot.slane %v2628_v52, 4  ;;  %v2663_v1 = vpop.xlane.xlu0 %2662 }
0x1c3c   :  { %v2664_v13 = vadd.f32 %v2978_v6, %v2663_v1 }
0x1c3d   :  { %v2630_v14 = vmax.f32 %v2628_v52, %v2629_v12 }
0x1c3e   :  { %v2665_v0 = vsel %vm2627_vm5, %v2664_v13, -inf }
0x1c3f   :  { %v2631_v15 = vrot.slane %v2630_v14, 2  ;;  %v2666_v16 = vrot.slane %v2665_v0, 4 }
0x1c41   :  { %v2632_v17 = vmax.f32 %v2630_v14, %v2631_v15  ;;  %v2667_v18 = vmax.f32 %v2665_v0, %v2666_v16  ;;  %v2705_v14 = vld [vmem:[%s4318_s4 + $0x28] sm:$0xff]  ;;  %v2979_v15 = vld [vmem:[%s4318_s4 + $0x33] ss:$0 sm:$0xff] }
0x1c43   :  { %v2633_v19 = vrot.slane %v2632_v17, 1  ;;  %v2668_v21 = vrot.slane %v2667_v18, 2 }
0x1c45   :  { %v2634_v22 = vmax.f32 %v2632_v17, %v2633_v19  ;;  %v2669_v23 = vmax.f32 %v2667_v18, %v2668_v21 }
0x1c47   :  { %v2635_v8 = vsub.f32 %v2626_v11, %v2634_v22  ;;  %v2670_v24 = vrot.slane %v2669_v23, 1 }
0x1c49   :  { %v2636_v26 = vmul.f32 1.442695, %v2635_v8  ;;  %v2671_v27 = vmax.f32 %v2669_v23, %v2670_v24 }
0x1c4b   :  { %3781 = vpow2.f32 %v2636_v26  ;;  %v2672_v28 = vsub.f32 %v2664_v13, %v2671_v27 }
0x1c4d   :  { %v2673_v29 = vmul.f32 1.442695, %v2672_v28 }
0x1c4f   :  { %3783 = vpow2.f32 %v2673_v29 }
0x1c55   :  { %v3782_v30 = vpop.eup %3781 }
0x1c56   :  { %v2638_v31 = vsel %vm2627_vm5, %v3782_v30, 0.0 }
0x1c57   :  { %v2639_v32 = vrot.slane %v2638_v31, 4 }
0x1c59   :  { %v3784_v63 = vpop.eup %3783  ;;  %v2640_v33 = vadd.f32 %v2639_v32, %v2638_v31 }
0x1c5a   :  { %v2675_v34 = vsel %vm2627_vm5, %v3784_v63, 0.0 }
0x1c5b   :  { %v2641_v5 = vrot.slane %v2640_v33, 2  ;;  %v2676_v35 = vrot.slane %v2675_v34, 4 }
0x1c5d   :  { %v2642_v3 = vadd.f32 %v2641_v5, %v2640_v33  ;;  %v2677_v4 = vadd.f32 %v2676_v35, %v2675_v34 }
0x1c5f   :  { %v2643_v38 = vrot.slane %v2642_v3, 1  ;;  %v2678_v39 = vrot.slane %v2677_v4, 2 }
0x1c61   :  { %v2644_v25 = vadd.f32 %v2643_v38, %v2642_v3  ;;  %v2679_v40 = vadd.f32 %v2678_v39, %v2677_v4 }
0x1c63   :  { %3785 = vrcp.f32 %v2644_v25  ;;  %v2680_v51 = vrot.slane %v2679_v40, 1 }
0x1c65   :  { %v2681_v41 = vadd.f32 %v2680_v51, %v2679_v40 }
0x1c67   :  { %3787 = vrcp.f32 %v2681_v41  ;;  %v2981_v41 = vld [vmem:[%s4318_s4 + $0x34] ss:$0 sm:$0xff] }
0x1c6d   :  { %v3786_v50 = vpop.eup %3785 }
0x1c6e   :  { %v2646_v20 = vmul.f32 %v3786_v50, %v3782_v30 }
0x1c70   :  { %2649 = vperm.xlu1 %3695, %v2646_v20  }
0x1c71   :  { %v3788_v48 = vpop.eup %3787 }
0x1c72   :  { %v2683_v43 = vmul.f32 %v3788_v48, %v3784_v63 }
0x1c74   :  { %2686 = vperm.xlu0 %3696, %v2683_v43  }
0x1cef   :  { %v2650_v54 = vpop.permute.xlu1 %2649 }
0x1cf0   :  { %v2652_v42 = vmul.f32 %v2650_v54, %v4255_v57 }
0x1cf2   :  { %v2653_v55 = vsel %vm87_vm1, %v2652_v42, 0.0 }
0x1cf3   :  { %v2654_v56 = vrot.slane %v2653_v55, 4  ;;  %v2687_v58 = vpop.permute.xlu0 %2686 }
0x1cf4   :  { %v2689_v60 = vmul.f32 %v2687_v58, %v4259_v62  ;;  %v2704_v62 = vld [vmem:[%s4318_s4 + $0x20] sm:$0xff] }
0x1cf5   :  { %v2655_v59 = vadd.f32 %v2654_v56, %v2653_v55  ;;  %v3592_v0 = vpack.c.bf16 %v2705_v14, %v2704_v62 }
0x1cf6   :  { %v2690_v61 = vsel %vm87_vm1, %v2689_v60, 0.0 }
0x1cf7   :  { %v2656_v2 = vrot.slane %v2655_v59, 2  ;;  %v2691_v9 = vrot.slane %v2690_v61, 4 }
0x1cf9   :  { %v2657_v7 = vadd.f32 %v2656_v2, %v2655_v59  ;;  %v2692_v6 = vadd.f32 %v2691_v9, %v2690_v61 }
0x1cfb   :  { %v2693_v10 = vrot.slane %v2692_v6, 2  ;;  %v2658_v11 = vrot.slane %v2657_v7, 1 }
0x1cfd   :  { %v2694_v52 = vadd.f32 %v2693_v10, %v2692_v6  ;;  %v2659_v1 = vadd.f32 %v2658_v11, %v2657_v7 }
0x1cff   :  { %v2695_v12 = vrot.slane %v2694_v52, 1 }
0x1d01   :  { %v2696_v57 = vadd.f32 %v2695_v12, %v2694_v52 }
0x1d03   :  { %v2698_v13 = vsel %vm2697_vm7, %v2659_v1, %v2696_v57 }
0x1d04   :  { %3384 = vmatmul.mubr.msk.f32.vlgmr.msra.gmra.mrb[28].mxu1 %vm87_vm1, %v2698_v13 }
0x1d05   :  { %3390 = vmatprep.mubr.msk.f32.mxu1 %vm3861_vm6, %v3862_v36  ;;  %3593 = vmatpush3.bf16.msra.mxu1 %v3592_v0 }
0x1dd7   :  { %v2780_v16 = vpop.f32.mrb[28].mxu1 }
0x1dd8   :  { %v2781_v17 = vadd.f32 %v2979_v15, %v2780_v16  ;;  %v3385_v18 = vpop.f32.mrb[29].mxu1 }
0x1dda   :  { %v2785_v19 = vmul.f32 0.70710677, %v2781_v17  ;;  %v2784_v25 = vmul.f32 0.5, %v2781_v17 }
0x1ddc   :  { %v2786_v21 = vand.u32 2147483647, %v2785_v19  ;;  %vm2806_vm8 = vcmp.ge.f32.partialorder %v2785_v19, 0.0 }
0x1dde   :  { %v2787_v22 = vmul.f32 0.3275911, %v2786_v21  ;;  %v2800_v8 = vsub.f32 0.0, %v2786_v21 }
0x1de0   :  { %v2788_v23 = vadd.f32 1.0, %v2787_v22  ;;  %v2801_v26 = vmul.f32 %v2800_v8, %v2786_v21 }
0x1de2   :  { %3789 = vrcp.f32 %v2788_v23  ;;  %v2802_v29 = vmul.f32 1.442695, %v2801_v26 }
0x1de4   :  { %3791 = vpow2.f32 %v2802_v29 }
0x1dec   :  { %v3790_v24 = vpop.eup %3789 }
0x1ded   :  { %v2791_v27 = vmul.f32 1.0614054, %v3790_v24 }
0x1dee   :  { %v3792_v35 = vpop.eup %3791 }
0x1def   :  { %v2792_v28 = vadd.f32 -1.4531521, %v2791_v27 }
0x1df1   :  { %v2793_v30 = vmul.f32 %v3790_v24, %v2792_v28 }
0x1df3   :  { %v2794_v31 = vadd.f32 1.4214138, %v2793_v30 }
0x1df5   :  { %v2795_v32 = vmul.f32 %v3790_v24, %v2794_v31 }
0x1df7   :  { %v2796_v63 = vadd.f32 -0.28449672, %v2795_v32 }
0x1df9   :  { %v2797_v33 = vmul.f32 %v3790_v24, %v2796_v63 }
0x1dfb   :  { %v2798_v34 = vadd.f32 0.2548296, %v2797_v33 }
0x1dfd   :  { %v2799_v5 = vmul.f32 %v3790_v24, %v2798_v34 }
0x1dff   :  { %v2804_v3 = vmul.f32 %v3792_v35, %v2799_v5 }
0x1e01   :  { %v2805_v4 = vsub.f32 1.0, %v2804_v3 }
0x1e03   :  { %v2807_v38 = vsub.f32 0.0, %v2805_v4 }
0x1e05   :  { %v2808_v39 = vsel %vm2806_vm8, %v2805_v4, %v2807_v38 }
0x1e06   :  { %v2809_v40 = vadd.f32 1.0, %v2808_v39 }
0x1e08   :  { %v2810_v51 = vmul.f32 %v2809_v40, %v2784_v25 }
0x1e0a   :  { %3391 = vmatmul.mubr.msk.f32.vlgmr.msra.gmra.mrb[30].mxu1 %vm79_vm0, %v2810_v51 }
0x1edd   :  { %v2884_v50 = vpop.f32.mrb[30].mxu1 }
0x1ede   :  { %v2885_v20 = vadd.f32 %v2981_v41, %v2884_v50  ;;  %v3392_v48 = vpop.f32.mrb[31].mxu1 }
0x1ee0   :  { %2888 = vst [vmem:[#allocation5] sm:$0x3] %v2885_v20 }
0x1ee1   :  { %3828 = shalt.err (!%p3825_p12)
}
0x1ee2   :  { %s3829_s7 = scalar_lea.hbm %s4319_s5, 32 }
0x1ee3   :  { %p3830_p13 = scmp.ne.s32.totalorder %s4319_s5, %s3829_s7  ;;  %p3833_p0 = scmp.lt.u32.totalorder %s3829_s7, %s4319_s5 }
0x1ee5   :  { %p3835_p1 = pnand %p3833_p0, %p3830_p13 }
0x1ee7   :  { %3838 = shalt.err (!%p3835_p1)
}
0x1ee8   :  { %2898 = dma.vmem_to_hbm [thread:$0]  %s2896_s27, 32, %s4319_s5, [#allocation4]  }
0x1ee9   :  { %3841 = dma.done.wait [#allocation4], 32  }
0x1eea   :  { %3842 = vsyncadd [#allocation4], 4294967264 }
0x1eeb   :  { %2902 = vsyncpa [#allocation3], 1 }
0x1eec   :  { %2903 = vsyncpa [#allocation4], 1 }

</bundles_post_ra>
